<compile_context>
chip_gen: v7x
topology: tpu7x:2x2x1
jax: 0.10.0
libtpu: 0.0.40
codegen_flags: <defaults>
</compile_context>

<pallas_src>
import functools

import jax
import jax.numpy as jnp
from jax.experimental import pallas as pl
from jax.experimental.pallas import tpu as pltpu


# ------------------------------ fused kernel --------------------------------

def fused_bca_kernel(
    x_ref, ctx_ref,
    ng_ref, nb_ref, cng_ref, cnb_ref,
    wqkv_ref, wcqkv_ref,
    wout_ref, bout_ref, wcout_ref, bcout_ref,
    out_ref, cout_ref,
    *, heads, dim_head, scale,
):
    f32 = jnp.float32

    def layernorm(t, g, b):
        mu = jnp.mean(t, axis=-1, keepdims=True)
        var = jnp.mean((t - mu) ** 2, axis=-1, keepdims=True)
        return (t - mu) * jax.lax.rsqrt(var + 1e-5) * g + b

    xn = layernorm(x_ref[...], ng_ref[...], nb_ref[...])      # (i, dim)
    cn = layernorm(ctx_ref[...], cng_ref[...], cnb_ref[...])  # (j, cdim)

    inner = heads * dim_head

    # fused QK|V projections (one wide MXU matmul per stream)
    qkv = jnp.dot(xn, wqkv_ref[...], preferred_element_type=f32)    # (i, 2*inner)
    cqkv = jnp.dot(cn, wcqkv_ref[...], preferred_element_type=f32)  # (j, 2*inner)
    qk, v = qkv[:, :inner], qkv[:, inner:]
    cqk, cv = cqkv[:, :inner], cqkv[:, inner:]

    i = xn.shape[0]
    j = cn.shape[0]
    out_acc = jnp.zeros((i, out_ref.shape[-1]), f32)
    cout_acc = jnp.zeros((j, cout_ref.shape[-1]), f32)

    contract_last = (((1,), (1,)), ((), ()))   # qk · cqk^T without materializing .T
    contract_first = (((0,), (0,)), ((), ()))  # cattn^T · v without materializing .T

    for h in range(heads):  # static unroll; heads stay on the lane axis
        sl = slice(h * dim_head, (h + 1) * dim_head)
        qk_h, v_h = qk[:, sl], v[:, sl]        # (i, d)
        cqk_h, cv_h = cqk[:, sl], cv[:, sl]    # (j, d)

        sim = jax.lax.dot_general(
            qk_h, cqk_h, contract_last, preferred_element_type=f32) * scale  # (i, j)

        # stable softmax over j (attn) — EUP reciprocal instead of VALU divide
        e1 = jnp.exp(sim - jnp.max(sim, axis=-1, keepdims=True))
        attn = e1 * pl.reciprocal(jnp.sum(e1, axis=-1, keepdims=True), approx=True)

        # stable softmax over i (context_attn)
        e2 = jnp.exp(sim - jnp.max(sim, axis=-2, keepdims=True))
        cattn = e2 * pl.reciprocal(jnp.sum(e2, axis=-2, keepdims=True), approx=True)

        out_h = jnp.dot(attn, cv_h, preferred_element_type=f32)                 # (i, d)
        cout_h = jax.lax.dot_general(
            cattn, v_h, contract_first, preferred_element_type=f32)             # (j, d)

        # fold "b h n d -> b n (h d)" + output projection into a per-head accumulate
        out_acc = out_acc + jnp.dot(out_h, wout_ref[sl, :], preferred_element_type=f32)
        cout_acc = cout_acc + jnp.dot(cout_h, wcout_ref[sl, :], preferred_element_type=f32)

    # single lane-dense store per output
    out_ref[...] = out_acc + bout_ref[...]
    cout_ref[...] = cout_acc + bcout_ref[...]


# ------------------------------ JAX wrapper ----------------------------------

def bidirectional_cross_attention(x, context, params, *, heads, dim_head):
    b, i, dim = x.shape
    _, j, cdim = context.shape
    inner = heads * dim_head
    scale = dim_head ** -0.5

    # fuse QK|V weights (one matmul per stream inside the kernel)
    w_qkv = jnp.concatenate([params["w_qk"], params["w_v"]], axis=1)      # (dim, 2*inner)
    w_cqkv = jnp.concatenate([params["w_cqk"], params["w_cv"]], axis=1)   # (cdim, 2*inner)

    kernel = functools.partial(
        fused_bca_kernel, heads=heads, dim_head=dim_head, scale=scale)

    bcast = lambda bi: (0, 0)  # replicated (weight / norm-param) blocks

    out, cout = pl.pallas_call(
        kernel,
        out_shape=(
            jax.ShapeDtypeStruct((b, i, dim), jnp.float32),
            jax.ShapeDtypeStruct((b, j, cdim), jnp.float32),
        ),
        grid=(b,),
        in_specs=[
            pl.BlockSpec((None, i, dim), lambda bi: (bi, 0, 0)),
            pl.BlockSpec((None, j, cdim), lambda bi: (bi, 0, 0)),
            pl.BlockSpec((1, dim), bcast),
            pl.BlockSpec((1, dim), bcast),
            pl.BlockSpec((1, cdim), bcast),
            pl.BlockSpec((1, cdim), bcast),
            pl.BlockSpec((dim, 2 * inner), bcast),
            pl.BlockSpec((cdim, 2 * inner), bcast),
            pl.BlockSpec((inner, dim), bcast),
            pl.BlockSpec((1, dim), bcast),
            pl.BlockSpec((inner, cdim), bcast),
            pl.BlockSpec((1, cdim), bcast),
        ],
        out_specs=(
            pl.BlockSpec((None, i, dim), lambda bi: (bi, 0, 0)),
            pl.BlockSpec((None, j, cdim), lambda bi: (bi, 0, 0)),
        ),
        compiler_params=pltpu.CompilerParams(dimension_semantics=("parallel",)),
    )(
        x, context,
        params["norm_g"].reshape(1, dim), params["norm_b"].reshape(1, dim),
        params["cnorm_g"].reshape(1, cdim), params["cnorm_b"].reshape(1, cdim),
        w_qkv, w_cqkv,
        params["w_out"], params["b_out"].reshape(1, dim),
        params["w_cout"], params["b_cout"].reshape(1, cdim),
    )
    return out, cout


# ----------------------------- pure-JAX reference ---------------------------

def reference(x, context, params, *, heads, dim_head):
    b, i, dim = x.shape
    _, j, cdim = context.shape
    scale = dim_head ** -0.5

    def ln(t, g, bta):
        mu = jnp.mean(t, axis=-1, keepdims=True)
        var = jnp.mean((t - mu) ** 2, axis=-1, keepdims=True)
        return (t - mu) * jax.lax.rsqrt(var + 1e-5) * g + bta

    xn = ln(x, params["norm_g"], params["norm_b"])
    cn = ln(context, params["cnorm_g"], params["cnorm_b"])

    def split(t, n):
        return t.reshape(b, n, heads, dim_head).transpose(0, 2, 1, 3)

    qk, v = split(xn @ params["w_qk"], i), split(xn @ params["w_v"], i)
    cqk, cv = split(cn @ params["w_cqk"], j), split(cn @ params["w_cv"], j)

    sim = jnp.einsum("bhid,bhjd->bhij", qk, cqk) * scale
    attn = jax.nn.softmax(sim - sim.max(-1, keepdims=True), axis=-1)
    cattn = jax.nn.softmax(sim - sim.max(-2, keepdims=True), axis=-2)

    out = jnp.einsum("bhij,bhjd->bhid", attn, cv)
    cout = jnp.einsum("bhij,bhid->bhjd", cattn, v)   # cattn^T @ v per (b,h)

    out = out.transpose(0, 2, 1, 3).reshape(b, i, heads * dim_head)
    cout = cout.transpose(0, 2, 1, 3).reshape(b, j, heads * dim_head)
    out = out @ params["w_out"] + params["b_out"]
    cout = cout @ params["w_cout"] + params["b_cout"]
    return out, cout


# ----------------------------------- main ------------------------------------

if __name__ == "__main__":
    # module config (small, synthetic)
    dim = 32
    context_dim = 32
    heads = 4
    dim_head = 8
    inner_dim = heads * dim_head

    batch, seq_i, seq_j = 2, 8, 16

    key = jax.random.PRNGKey(0)
    ks = jax.random.split(key, 10)

    params = {
        # LayerNorm default init: weight=1, bias=0
        "norm_g": jnp.ones((dim,), jnp.float32),
        "norm_b": jnp.zeros((dim,), jnp.float32),
        "cnorm_g": jnp.ones((context_dim,), jnp.float32),
        "cnorm_b": jnp.zeros((context_dim,), jnp.float32),
        # Linear weights stored as (in, out); torch stores (out, in) and applies x @ W^T.
        "w_qk": 0.02 * jax.random.normal(ks[0], (dim, inner_dim), jnp.float32),
        "w_v": 0.02 * jax.random.normal(ks[1], (dim, inner_dim), jnp.float32),
        "w_cqk": 0.02 * jax.random.normal(ks[2], (context_dim, inner_dim), jnp.float32),
        "w_cv": 0.02 * jax.random.normal(ks[3], (context_dim, inner_dim), jnp.float32),
        "w_out": 0.02 * jax.random.normal(ks[4], (inner_dim, dim), jnp.float32),
        "b_out": 0.02 * jax.random.normal(ks[5], (dim,), jnp.float32),
        "w_cout": 0.02 * jax.random.normal(ks[6], (inner_dim, context_dim), jnp.float32),
        "b_cout": 0.02 * jax.random.normal(ks[7], (context_dim,), jnp.float32),
    }

    x = jax.random.normal(ks[8], (batch, seq_i, dim), jnp.float32)
    context = jax.random.normal(ks[9], (batch, seq_j, context_dim), jnp.float32)

    out, context_out = bidirectional_cross_attention(
        x, context, params, heads=heads, dim_head=dim_head
    )
    out = jax.block_until_ready(out)
    context_out = jax.block_until_ready(context_out)

    ref_out, ref_cout = reference(x, context, params, heads=heads, dim_head=dim_head)

    assert out.shape == (batch, seq_i, dim)
    assert context_out.shape == (batch, seq_j, context_dim)
    # tolerance accommodates the EUP approx-reciprocal softmax denominator
    assert jnp.allclose(out, ref_out, rtol=2e-3, atol=2e-3)
    assert jnp.allclose(context_out, ref_cout, rtol=2e-3, atol=2e-3)

    print("KERNEL_OK")
</pallas_src>

<mosaic_0001>
module attributes {stable_mosaic.version = 11 : i64} {
  func.func @fused_bca_kernel(%arg0: i32, %arg1: memref<1x8x32xf32, #tpu.memory_space<vmem>>, %arg2: memref<1x16x32xf32, #tpu.memory_space<vmem>>, %arg3: memref<1x32xf32, #tpu.memory_space<vmem>>, %arg4: memref<1x32xf32, #tpu.memory_space<vmem>>, %arg5: memref<1x32xf32, #tpu.memory_space<vmem>>, %arg6: memref<1x32xf32, #tpu.memory_space<vmem>>, %arg7: memref<32x64xf32, #tpu.memory_space<vmem>>, %arg8: memref<32x64xf32, #tpu.memory_space<vmem>>, %arg9: memref<32x32xf32, #tpu.memory_space<vmem>>, %arg10: memref<1x32xf32, #tpu.memory_space<vmem>>, %arg11: memref<32x32xf32, #tpu.memory_space<vmem>>, %arg12: memref<1x32xf32, #tpu.memory_space<vmem>>, %arg13: memref<1x8x32xf32, #tpu.memory_space<vmem>>, %arg14: memref<1x16x32xf32, #tpu.memory_space<vmem>>) attributes {dimension_semantics = [#tpu.dimension_semantics<parallel>], iteration_bounds = array<i64: 2>, scalar_prefetch = 0 : i64, scratch_operands = 0 : i64, tpu.core_type = #tpu.core_type<tc>, window_params = [{transform_indices = @transform_0, window_bounds = array<i64: 1, 8, 32>}, {transform_indices = @transform_1, window_bounds = array<i64: 1, 16, 32>}, {pipeline_mode = #tpu.pipeline_mode<synchronous>, transform_indices = @transform_2, window_bounds = array<i64: 1, 32>}, {pipeline_mode = #tpu.pipeline_mode<synchronous>, transform_indices = @transform_3, window_bounds = array<i64: 1, 32>}, {pipeline_mode = #tpu.pipeline_mode<synchronous>, transform_indices = @transform_4, window_bounds = array<i64: 1, 32>}, {pipeline_mode = #tpu.pipeline_mode<synchronous>, transform_indices = @transform_5, window_bounds = array<i64: 1, 32>}, {pipeline_mode = #tpu.pipeline_mode<synchronous>, transform_indices = @transform_6, window_bounds = array<i64: 32, 64>}, {pipeline_mode = #tpu.pipeline_mode<synchronous>, transform_indices = @transform_7, window_bounds = array<i64: 32, 64>}, {pipeline_mode = #tpu.pipeline_mode<synchronous>, transform_indices = @transform_8, window_bounds = array<i64: 32, 32>}, {pipeline_mode = #tpu.pipeline_mode<synchronous>, transform_indices = @transform_9, window_bounds = array<i64: 1, 32>}, {pipeline_mode = #tpu.pipeline_mode<synchronous>, transform_indices = @transform_10, window_bounds = array<i64: 32, 32>}, {pipeline_mode = #tpu.pipeline_mode<synchronous>, transform_indices = @transform_11, window_bounds = array<i64: 1, 32>}, {transform_indices = @transform_12, window_bounds = array<i64: 1, 8, 32>}, {transform_indices = @transform_13, window_bounds = array<i64: 1, 16, 32>}]} {
    %c0 = arith.constant 0 : index
    %c0_0 = arith.constant 0 : index
    %c0_1 = arith.constant 0 : index
    %0 = vector.load %arg1[%c0, %c0_0, %c0_1] : memref<1x8x32xf32, #tpu.memory_space<vmem>>, vector<1x8x32xf32>
    %1 = vector.shape_cast %0 : vector<1x8x32xf32> to vector<8x32xf32>
    %c0_2 = arith.constant 0 : index
    %c0_3 = arith.constant 0 : index
    %2 = vector.load %arg3[%c0_2, %c0_3] : memref<1x32xf32, #tpu.memory_space<vmem>>, vector<1x32xf32>
    %c0_4 = arith.constant 0 : index
    %c0_5 = arith.constant 0 : index
    %3 = vector.load %arg4[%c0_4, %c0_5] : memref<1x32xf32, #tpu.memory_space<vmem>>, vector<1x32xf32>
    %cst = arith.constant dense<0.000000e+00> : vector<8xf32>
    %4 = vector.multi_reduction <add>, %1, %cst [1] : vector<8x32xf32> to vector<8xf32>
    %5 = vector.shape_cast %4 : vector<8xf32> to vector<8x1xf32>
    %cst_6 = arith.constant 3.200000e+01 : f32
    %6 = vector.broadcast %cst_6 : f32 to vector<8x1xf32>
    %7 = arith.divf %5, %6 : vector<8x1xf32>
    %8 = vector.broadcast %7 : vector<8x1xf32> to vector<8x32xf32>
    %9 = arith.subf %1, %8 : vector<8x32xf32>
    %10 = arith.mulf %9, %9 : vector<8x32xf32>
    %cst_7 = arith.constant dense<0.000000e+00> : vector<8xf32>
    %11 = vector.multi_reduction <add>, %10, %cst_7 [1] : vector<8x32xf32> to vector<8xf32>
    %12 = vector.shape_cast %11 : vector<8xf32> to vector<8x1xf32>
    %cst_8 = arith.constant 3.200000e+01 : f32
    %13 = vector.broadcast %cst_8 : f32 to vector<8x1xf32>
    %14 = arith.divf %12, %13 : vector<8x1xf32>
    %15 = vector.broadcast %7 : vector<8x1xf32> to vector<8x32xf32>
    %16 = arith.subf %1, %15 : vector<8x32xf32>
    %cst_9 = arith.constant 9.99999974E-6 : f32
    %17 = vector.broadcast %cst_9 : f32 to vector<8x1xf32>
    %18 = arith.addf %14, %17 : vector<8x1xf32>
    %19 = math.rsqrt %18 : vector<8x1xf32>
    %20 = vector.broadcast %19 : vector<8x1xf32> to vector<8x32xf32>
    %21 = arith.mulf %16, %20 : vector<8x32xf32>
    %22 = vector.broadcast %2 : vector<1x32xf32> to vector<8x32xf32>
    %23 = arith.mulf %21, %22 : vector<8x32xf32>
    %24 = vector.broadcast %3 : vector<1x32xf32> to vector<8x32xf32>
    %25 = arith.addf %23, %24 : vector<8x32xf32>
    %c0_10 = arith.constant 0 : index
    %c0_11 = arith.constant 0 : index
    %c0_12 = arith.constant 0 : index
    %26 = vector.load %arg2[%c0_10, %c0_11, %c0_12] : memref<1x16x32xf32, #tpu.memory_space<vmem>>, vector<1x16x32xf32>
    %27 = vector.shape_cast %26 : vector<1x16x32xf32> to vector<16x32xf32>
    %c0_13 = arith.constant 0 : index
    %c0_14 = arith.constant 0 : index
    %28 = vector.load %arg5[%c0_13, %c0_14] : memref<1x32xf32, #tpu.memory_space<vmem>>, vector<1x32xf32>
    %c0_15 = arith.constant 0 : index
    %c0_16 = arith.constant 0 : index
    %29 = vector.load %arg6[%c0_15, %c0_16] : memref<1x32xf32, #tpu.memory_space<vmem>>, vector<1x32xf32>
    %cst_17 = arith.constant dense<0.000000e+00> : vector<16xf32>
    %30 = vector.multi_reduction <add>, %27, %cst_17 [1] : vector<16x32xf32> to vector<16xf32>
    %31 = vector.shape_cast %30 : vector<16xf32> to vector<16x1xf32>
    %cst_18 = arith.constant 3.200000e+01 : f32
    %32 = vector.broadcast %cst_18 : f32 to vector<16x1xf32>
    %33 = arith.divf %31, %32 : vector<16x1xf32>
    %34 = vector.broadcast %33 : vector<16x1xf32> to vector<16x32xf32>
    %35 = arith.subf %27, %34 : vector<16x32xf32>
    %36 = arith.mulf %35, %35 : vector<16x32xf32>
    %cst_19 = arith.constant dense<0.000000e+00> : vector<16xf32>
    %37 = vector.multi_reduction <add>, %36, %cst_19 [1] : vector<16x32xf32> to vector<16xf32>
    %38 = vector.shape_cast %37 : vector<16xf32> to vector<16x1xf32>
    %cst_20 = arith.constant 3.200000e+01 : f32
    %39 = vector.broadcast %cst_20 : f32 to vector<16x1xf32>
    %40 = arith.divf %38, %39 : vector<16x1xf32>
    %41 = vector.broadcast %33 : vector<16x1xf32> to vector<16x32xf32>
    %42 = arith.subf %27, %41 : vector<16x32xf32>
    %cst_21 = arith.constant 9.99999974E-6 : f32
    %43 = vector.broadcast %cst_21 : f32 to vector<16x1xf32>
    %44 = arith.addf %40, %43 : vector<16x1xf32>
    %45 = math.rsqrt %44 : vector<16x1xf32>
    %46 = vector.broadcast %45 : vector<16x1xf32> to vector<16x32xf32>
    %47 = arith.mulf %42, %46 : vector<16x32xf32>
    %48 = vector.broadcast %28 : vector<1x32xf32> to vector<16x32xf32>
    %49 = arith.mulf %47, %48 : vector<16x32xf32>
    %50 = vector.broadcast %29 : vector<1x32xf32> to vector<16x32xf32>
    %51 = arith.addf %49, %50 : vector<16x32xf32>
    %c0_22 = arith.constant 0 : index
    %c0_23 = arith.constant 0 : index
    %52 = vector.load %arg7[%c0_22, %c0_23] : memref<32x64xf32, #tpu.memory_space<vmem>>, vector<32x64xf32>
    %cst_24 = arith.constant dense<0.000000e+00> : vector<8x64xf32>
    %53 = tpu.matmul %25, %52, %cst_24 {dimension_numbers = #tpu.dot_dimension_numbers<[1], [0], [0], [1], [0, 0, 1, 1], [], []>} : vector<8x32xf32>, vector<32x64xf32>, vector<8x64xf32> -> vector<8x64xf32>
    %c0_25 = arith.constant 0 : index
    %c0_26 = arith.constant 0 : index
    %54 = vector.load %arg8[%c0_25, %c0_26] : memref<32x64xf32, #tpu.memory_space<vmem>>, vector<32x64xf32>
    %cst_27 = arith.constant dense<0.000000e+00> : vector<16x64xf32>
    %55 = tpu.matmul %51, %54, %cst_27 {dimension_numbers = #tpu.dot_dimension_numbers<[1], [0], [0], [1], [0, 0, 1, 1], [], []>} : vector<16x32xf32>, vector<32x64xf32>, vector<16x64xf32> -> vector<16x64xf32>
    %56 = vector.extract_strided_slice %53 {offsets = [0, 0], sizes = [8, 32], strides = [1, 1]} : vector<8x64xf32> to vector<8x32xf32>
    %57 = vector.extract_strided_slice %53 {offsets = [0, 32], sizes = [8, 32], strides = [1, 1]} : vector<8x64xf32> to vector<8x32xf32>
    %58 = vector.extract_strided_slice %55 {offsets = [0, 0], sizes = [16, 32], strides = [1, 1]} : vector<16x64xf32> to vector<16x32xf32>
    %59 = vector.extract_strided_slice %55 {offsets = [0, 32], sizes = [16, 32], strides = [1, 1]} : vector<16x64xf32> to vector<16x32xf32>
    %cst_28 = arith.constant 0.000000e+00 : f32
    %60 = vector.broadcast %cst_28 : f32 to vector<8x32xf32>
    %cst_29 = arith.constant 0.000000e+00 : f32
    %61 = vector.broadcast %cst_29 : f32 to vector<16x32xf32>
    %62 = vector.extract_strided_slice %56 {offsets = [0, 0], sizes = [8, 8], strides = [1, 1]} : vector<8x32xf32> to vector<8x8xf32>
    %63 = vector.extract_strided_slice %57 {offsets = [0, 0], sizes = [8, 8], strides = [1, 1]} : vector<8x32xf32> to vector<8x8xf32>
    %64 = vector.extract_strided_slice %58 {offsets = [0, 0], sizes = [16, 8], strides = [1, 1]} : vector<16x32xf32> to vector<16x8xf32>
    %65 = vector.extract_strided_slice %59 {offsets = [0, 0], sizes = [16, 8], strides = [1, 1]} : vector<16x32xf32> to vector<16x8xf32>
    %cst_30 = arith.constant dense<0.000000e+00> : vector<8x16xf32>
    %66 = tpu.matmul %62, %64, %cst_30 {dimension_numbers = #tpu.dot_dimension_numbers<[1], [1], [0], [0], [0, 0, 1, 0], [], []>} : vector<8x8xf32>, vector<16x8xf32>, vector<8x16xf32> -> vector<8x16xf32>
    %cst_31 = arith.constant 0.353553385 : f32
    %67 = vector.broadcast %cst_31 : f32 to vector<8x16xf32>
    %68 = arith.mulf %66, %67 : vector<8x16xf32>
    %cst_32 = arith.constant dense<0xFF800000> : vector<8xf32>
    %69 = vector.multi_reduction <maximumf>, %68, %cst_32 [1] : vector<8x16xf32> to vector<8xf32>
    %70 = vector.shape_cast %69 : vector<8xf32> to vector<8x1xf32>
    %71 = vector.broadcast %70 : vector<8x1xf32> to vector<8x16xf32>
    %72 = arith.subf %68, %71 : vector<8x16xf32>
    %73 = math.exp %72 : vector<8x16xf32>
    %cst_33 = arith.constant dense<0.000000e+00> : vector<8xf32>
    %74 = vector.multi_reduction <add>, %73, %cst_33 [1] : vector<8x16xf32> to vector<8xf32>
    %75 = vector.shape_cast %74 : vector<8xf32> to vector<8x1xf32>
    %76 = tpu.reciprocal %75 {approx = true} : vector<8x1xf32> -> vector<8x1xf32>
    %77 = vector.broadcast %76 : vector<8x1xf32> to vector<8x16xf32>
    %78 = arith.mulf %73, %77 : vector<8x16xf32>
    %cst_34 = arith.constant dense<0xFF800000> : vector<16xf32>
    %79 = vector.multi_reduction <maximumf>, %68, %cst_34 [0] : vector<8x16xf32> to vector<16xf32>
    %80 = vector.shape_cast %79 : vector<16xf32> to vector<1x16xf32>
    %81 = vector.broadcast %80 : vector<1x16xf32> to vector<8x16xf32>
    %82 = arith.subf %68, %81 : vector<8x16xf32>
    %83 = math.exp %82 : vector<8x16xf32>
    %cst_35 = arith.constant dense<0.000000e+00> : vector<16xf32>
    %84 = vector.multi_reduction <add>, %83, %cst_35 [0] : vector<8x16xf32> to vector<16xf32>
    %85 = vector.shape_cast %84 : vector<16xf32> to vector<1x16xf32>
    %86 = tpu.reciprocal %85 {approx = true} : vector<1x16xf32> -> vector<1x16xf32>
    %87 = vector.broadcast %86 : vector<1x16xf32> to vector<8x16xf32>
    %88 = arith.mulf %83, %87 : vector<8x16xf32>
    %cst_36 = arith.constant dense<0.000000e+00> : vector<8x8xf32>
    %89 = tpu.matmul %78, %65, %cst_36 {dimension_numbers = #tpu.dot_dimension_numbers<[1], [0], [0], [1], [0, 0, 1, 1], [], []>} : vector<8x16xf32>, vector<16x8xf32>, vector<8x8xf32> -> vector<8x8xf32>
    %cst_37 = arith.constant dense<0.000000e+00> : vector<16x8xf32>
    %90 = tpu.matmul %88, %63, %cst_37 {dimension_numbers = #tpu.dot_dimension_numbers<[0], [0], [1], [1], [0, 1, 1, 1], [], []>} : vector<8x16xf32>, vector<8x8xf32>, vector<16x8xf32> -> vector<16x8xf32>
    %c0_38 = arith.constant 0 : index
    %c0_39 = arith.constant 0 : index
    %91 = vector.load %arg9[%c0_38, %c0_39] : memref<32x32xf32, #tpu.memory_space<vmem>>, vector<8x32xf32>
    %cst_40 = arith.constant dense<0.000000e+00> : vector<8x32xf32>
    %92 = tpu.matmul %89, %91, %cst_40 {dimension_numbers = #tpu.dot_dimension_numbers<[1], [0], [0], [1], [0, 0, 1, 1], [], []>} : vector<8x8xf32>, vector<8x32xf32>, vector<8x32xf32> -> vector<8x32xf32>
    %93 = arith.addf %60, %92 : vector<8x32xf32>
    %c0_41 = arith.constant 0 : index
    %c0_42 = arith.constant 0 : index
    %94 = vector.load %arg11[%c0_41, %c0_42] : memref<32x32xf32, #tpu.memory_space<vmem>>, vector<8x32xf32>
    %cst_43 = arith.constant dense<0.000000e+00> : vector<16x32xf32>
    %95 = tpu.matmul %90, %94, %cst_43 {dimension_numbers = #tpu.dot_dimension_numbers<[1], [0], [0], [1], [0, 0, 1, 1], [], []>} : vector<16x8xf32>, vector<8x32xf32>, vector<16x32xf32> -> vector<16x32xf32>
    %96 = arith.addf %61, %95 : vector<16x32xf32>
    %97 = vector.extract_strided_slice %56 {offsets = [0, 8], sizes = [8, 8], strides = [1, 1]} : vector<8x32xf32> to vector<8x8xf32>
    %98 = vector.extract_strided_slice %57 {offsets = [0, 8], sizes = [8, 8], strides = [1, 1]} : vector<8x32xf32> to vector<8x8xf32>
    %99 = vector.extract_strided_slice %58 {offsets = [0, 8], sizes = [16, 8], strides = [1, 1]} : vector<16x32xf32> to vector<16x8xf32>
    %100 = vector.extract_strided_slice %59 {offsets = [0, 8], sizes = [16, 8], strides = [1, 1]} : vector<16x32xf32> to vector<16x8xf32>
    %cst_44 = arith.constant dense<0.000000e+00> : vector<8x16xf32>
    %101 = tpu.matmul %97, %99, %cst_44 {dimension_numbers = #tpu.dot_dimension_numbers<[1], [1], [0], [0], [0, 0, 1, 0], [], []>} : vector<8x8xf32>, vector<16x8xf32>, vector<8x16xf32> -> vector<8x16xf32>
    %cst_45 = arith.constant 0.353553385 : f32
    %102 = vector.broadcast %cst_45 : f32 to vector<8x16xf32>
    %103 = arith.mulf %101, %102 : vector<8x16xf32>
    %cst_46 = arith.constant dense<0xFF800000> : vector<8xf32>
    %104 = vector.multi_reduction <maximumf>, %103, %cst_46 [1] : vector<8x16xf32> to vector<8xf32>
    %105 = vector.shape_cast %104 : vector<8xf32> to vector<8x1xf32>
    %106 = vector.broadcast %105 : vector<8x1xf32> to vector<8x16xf32>
    %107 = arith.subf %103, %106 : vector<8x16xf32>
    %108 = math.exp %107 : vector<8x16xf32>
    %cst_47 = arith.constant dense<0.000000e+00> : vector<8xf32>
    %109 = vector.multi_reduction <add>, %108, %cst_47 [1] : vector<8x16xf32> to vector<8xf32>
    %110 = vector.shape_cast %109 : vector<8xf32> to vector<8x1xf32>
    %111 = tpu.reciprocal %110 {approx = true} : vector<8x1xf32> -> vector<8x1xf32>
    %112 = vector.broadcast %111 : vector<8x1xf32> to vector<8x16xf32>
    %113 = arith.mulf %108, %112 : vector<8x16xf32>
    %cst_48 = arith.constant dense<0xFF800000> : vector<16xf32>
    %114 = vector.multi_reduction <maximumf>, %103, %cst_48 [0] : vector<8x16xf32> to vector<16xf32>
    %115 = vector.shape_cast %114 : vector<16xf32> to vector<1x16xf32>
    %116 = vector.broadcast %115 : vector<1x16xf32> to vector<8x16xf32>
    %117 = arith.subf %103, %116 : vector<8x16xf32>
    %118 = math.exp %117 : vector<8x16xf32>
    %cst_49 = arith.constant dense<0.000000e+00> : vector<16xf32>
    %119 = vector.multi_reduction <add>, %118, %cst_49 [0] : vector<8x16xf32> to vector<16xf32>
    %120 = vector.shape_cast %119 : vector<16xf32> to vector<1x16xf32>
    %121 = tpu.reciprocal %120 {approx = true} : vector<1x16xf32> -> vector<1x16xf32>
    %122 = vector.broadcast %121 : vector<1x16xf32> to vector<8x16xf32>
    %123 = arith.mulf %118, %122 : vector<8x16xf32>
    %cst_50 = arith.constant dense<0.000000e+00> : vector<8x8xf32>
    %124 = tpu.matmul %113, %100, %cst_50 {dimension_numbers = #tpu.dot_dimension_numbers<[1], [0], [0], [1], [0, 0, 1, 1], [], []>} : vector<8x16xf32>, vector<16x8xf32>, vector<8x8xf32> -> vector<8x8xf32>
    %cst_51 = arith.constant dense<0.000000e+00> : vector<16x8xf32>
    %125 = tpu.matmul %123, %98, %cst_51 {dimension_numbers = #tpu.dot_dimension_numbers<[0], [0], [1], [1], [0, 1, 1, 1], [], []>} : vector<8x16xf32>, vector<8x8xf32>, vector<16x8xf32> -> vector<16x8xf32>
    %c8 = arith.constant 8 : index
    %c0_52 = arith.constant 0 : index
    %126 = vector.load %arg9[%c8, %c0_52] : memref<32x32xf32, #tpu.memory_space<vmem>>, vector<8x32xf32>
    %cst_53 = arith.constant dense<0.000000e+00> : vector<8x32xf32>
    %127 = tpu.matmul %124, %126, %cst_53 {dimension_numbers = #tpu.dot_dimension_numbers<[1], [0], [0], [1], [0, 0, 1, 1], [], []>} : vector<8x8xf32>, vector<8x32xf32>, vector<8x32xf32> -> vector<8x32xf32>
    %128 = arith.addf %93, %127 : vector<8x32xf32>
    %c8_54 = arith.constant 8 : index
    %c0_55 = arith.constant 0 : index
    %129 = vector.load %arg11[%c8_54, %c0_55] : memref<32x32xf32, #tpu.memory_space<vmem>>, vector<8x32xf32>
    %cst_56 = arith.constant dense<0.000000e+00> : vector<16x32xf32>
    %130 = tpu.matmul %125, %129, %cst_56 {dimension_numbers = #tpu.dot_dimension_numbers<[1], [0], [0], [1], [0, 0, 1, 1], [], []>} : vector<16x8xf32>, vector<8x32xf32>, vector<16x32xf32> -> vector<16x32xf32>
    %131 = arith.addf %96, %130 : vector<16x32xf32>
    %132 = vector.extract_strided_slice %56 {offsets = [0, 16], sizes = [8, 8], strides = [1, 1]} : vector<8x32xf32> to vector<8x8xf32>
    %133 = vector.extract_strided_slice %57 {offsets = [0, 16], sizes = [8, 8], strides = [1, 1]} : vector<8x32xf32> to vector<8x8xf32>
    %134 = vector.extract_strided_slice %58 {offsets = [0, 16], sizes = [16, 8], strides = [1, 1]} : vector<16x32xf32> to vector<16x8xf32>
    %135 = vector.extract_strided_slice %59 {offsets = [0, 16], sizes = [16, 8], strides = [1, 1]} : vector<16x32xf32> to vector<16x8xf32>
    %cst_57 = arith.constant dense<0.000000e+00> : vector<8x16xf32>
    %136 = tpu.matmul %132, %134, %cst_57 {dimension_numbers = #tpu.dot_dimension_numbers<[1], [1], [0], [0], [0, 0, 1, 0], [], []>} : vector<8x8xf32>, vector<16x8xf32>, vector<8x16xf32> -> vector<8x16xf32>
    %cst_58 = arith.constant 0.353553385 : f32
    %137 = vector.broadcast %cst_58 : f32 to vector<8x16xf32>
    %138 = arith.mulf %136, %137 : vector<8x16xf32>
    %cst_59 = arith.constant dense<0xFF800000> : vector<8xf32>
    %139 = vector.multi_reduction <maximumf>, %138, %cst_59 [1] : vector<8x16xf32> to vector<8xf32>
    %140 = vector.shape_cast %139 : vector<8xf32> to vector<8x1xf32>
    %141 = vector.broadcast %140 : vector<8x1xf32> to vector<8x16xf32>
    %142 = arith.subf %138, %141 : vector<8x16xf32>
    %143 = math.exp %142 : vector<8x16xf32>
    %cst_60 = arith.constant dense<0.000000e+00> : vector<8xf32>
    %144 = vector.multi_reduction <add>, %143, %cst_60 [1] : vector<8x16xf32> to vector<8xf32>
    %145 = vector.shape_cast %144 : vector<8xf32> to vector<8x1xf32>
    %146 = tpu.reciprocal %145 {approx = true} : vector<8x1xf32> -> vector<8x1xf32>
    %147 = vector.broadcast %146 : vector<8x1xf32> to vector<8x16xf32>
    %148 = arith.mulf %143, %147 : vector<8x16xf32>
    %cst_61 = arith.constant dense<0xFF800000> : vector<16xf32>
    %149 = vector.multi_reduction <maximumf>, %138, %cst_61 [0] : vector<8x16xf32> to vector<16xf32>
    %150 = vector.shape_cast %149 : vector<16xf32> to vector<1x16xf32>
    %151 = vector.broadcast %150 : vector<1x16xf32> to vector<8x16xf32>
    %152 = arith.subf %138, %151 : vector<8x16xf32>
    %153 = math.exp %152 : vector<8x16xf32>
    %cst_62 = arith.constant dense<0.000000e+00> : vector<16xf32>
    %154 = vector.multi_reduction <add>, %153, %cst_62 [0] : vector<8x16xf32> to vector<16xf32>
    %155 = vector.shape_cast %154 : vector<16xf32> to vector<1x16xf32>
    %156 = tpu.reciprocal %155 {approx = true} : vector<1x16xf32> -> vector<1x16xf32>
    %157 = vector.broadcast %156 : vector<1x16xf32> to vector<8x16xf32>
    %158 = arith.mulf %153, %157 : vector<8x16xf32>
    %cst_63 = arith.constant dense<0.000000e+00> : vector<8x8xf32>
    %159 = tpu.matmul %148, %135, %cst_63 {dimension_numbers = #tpu.dot_dimension_numbers<[1], [0], [0], [1], [0, 0, 1, 1], [], []>} : vector<8x16xf32>, vector<16x8xf32>, vector<8x8xf32> -> vector<8x8xf32>
    %cst_64 = arith.constant dense<0.000000e+00> : vector<16x8xf32>
    %160 = tpu.matmul %158, %133, %cst_64 {dimension_numbers = #tpu.dot_dimension_numbers<[0], [0], [1], [1], [0, 1, 1, 1], [], []>} : vector<8x16xf32>, vector<8x8xf32>, vector<16x8xf32> -> vector<16x8xf32>
    %c16 = arith.constant 16 : index
    %c0_65 = arith.constant 0 : index
    %161 = vector.load %arg9[%c16, %c0_65] : memref<32x32xf32, #tpu.memory_space<vmem>>, vector<8x32xf32>
    %cst_66 = arith.constant dense<0.000000e+00> : vector<8x32xf32>
    %162 = tpu.matmul %159, %161, %cst_66 {dimension_numbers = #tpu.dot_dimension_numbers<[1], [0], [0], [1], [0, 0, 1, 1], [], []>} : vector<8x8xf32>, vector<8x32xf32>, vector<8x32xf32> -> vector<8x32xf32>
    %163 = arith.addf %128, %162 : vector<8x32xf32>
    %c16_67 = arith.constant 16 : index
    %c0_68 = arith.constant 0 : index
    %164 = vector.load %arg11[%c16_67, %c0_68] : memref<32x32xf32, #tpu.memory_space<vmem>>, vector<8x32xf32>
    %cst_69 = arith.constant dense<0.000000e+00> : vector<16x32xf32>
    %165 = tpu.matmul %160, %164, %cst_69 {dimension_numbers = #tpu.dot_dimension_numbers<[1], [0], [0], [1], [0, 0, 1, 1], [], []>} : vector<16x8xf32>, vector<8x32xf32>, vector<16x32xf32> -> vector<16x32xf32>
    %166 = arith.addf %131, %165 : vector<16x32xf32>
    %167 = vector.extract_strided_slice %56 {offsets = [0, 24], sizes = [8, 8], strides = [1, 1]} : vector<8x32xf32> to vector<8x8xf32>
    %168 = vector.extract_strided_slice %57 {offsets = [0, 24], sizes = [8, 8], strides = [1, 1]} : vector<8x32xf32> to vector<8x8xf32>
    %169 = vector.extract_strided_slice %58 {offsets = [0, 24], sizes = [16, 8], strides = [1, 1]} : vector<16x32xf32> to vector<16x8xf32>
    %170 = vector.extract_strided_slice %59 {offsets = [0, 24], sizes = [16, 8], strides = [1, 1]} : vector<16x32xf32> to vector<16x8xf32>
    %cst_70 = arith.constant dense<0.000000e+00> : vector<8x16xf32>
    %171 = tpu.matmul %167, %169, %cst_70 {dimension_numbers = #tpu.dot_dimension_numbers<[1], [1], [0], [0], [0, 0, 1, 0], [], []>} : vector<8x8xf32>, vector<16x8xf32>, vector<8x16xf32> -> vector<8x16xf32>
    %cst_71 = arith.constant 0.353553385 : f32
    %172 = vector.broadcast %cst_71 : f32 to vector<8x16xf32>
    %173 = arith.mulf %171, %172 : vector<8x16xf32>
    %cst_72 = arith.constant dense<0xFF800000> : vector<8xf32>
    %174 = vector.multi_reduction <maximumf>, %173, %cst_72 [1] : vector<8x16xf32> to vector<8xf32>
    %175 = vector.shape_cast %174 : vector<8xf32> to vector<8x1xf32>
    %176 = vector.broadcast %175 : vector<8x1xf32> to vector<8x16xf32>
    %177 = arith.subf %173, %176 : vector<8x16xf32>
    %178 = math.exp %177 : vector<8x16xf32>
    %cst_73 = arith.constant dense<0.000000e+00> : vector<8xf32>
    %179 = vector.multi_reduction <add>, %178, %cst_73 [1] : vector<8x16xf32> to vector<8xf32>
    %180 = vector.shape_cast %179 : vector<8xf32> to vector<8x1xf32>
    %181 = tpu.reciprocal %180 {approx = true} : vector<8x1xf32> -> vector<8x1xf32>
    %182 = vector.broadcast %181 : vector<8x1xf32> to vector<8x16xf32>
    %183 = arith.mulf %178, %182 : vector<8x16xf32>
    %cst_74 = arith.constant dense<0xFF800000> : vector<16xf32>
    %184 = vector.multi_reduction <maximumf>, %173, %cst_74 [0] : vector<8x16xf32> to vector<16xf32>
    %185 = vector.shape_cast %184 : vector<16xf32> to vector<1x16xf32>
    %186 = vector.broadcast %185 : vector<1x16xf32> to vector<8x16xf32>
    %187 = arith.subf %173, %186 : vector<8x16xf32>
    %188 = math.exp %187 : vector<8x16xf32>
    %cst_75 = arith.constant dense<0.000000e+00> : vector<16xf32>
    %189 = vector.multi_reduction <add>, %188, %cst_75 [0] : vector<8x16xf32> to vector<16xf32>
    %190 = vector.shape_cast %189 : vector<16xf32> to vector<1x16xf32>
    %191 = tpu.reciprocal %190 {approx = true} : vector<1x16xf32> -> vector<1x16xf32>
    %192 = vector.broadcast %191 : vector<1x16xf32> to vector<8x16xf32>
    %193 = arith.mulf %188, %192 : vector<8x16xf32>
    %cst_76 = arith.constant dense<0.000000e+00> : vector<8x8xf32>
    %194 = tpu.matmul %183, %170, %cst_76 {dimension_numbers = #tpu.dot_dimension_numbers<[1], [0], [0], [1], [0, 0, 1, 1], [], []>} : vector<8x16xf32>, vector<16x8xf32>, vector<8x8xf32> -> vector<8x8xf32>
    %cst_77 = arith.constant dense<0.000000e+00> : vector<16x8xf32>
    %195 = tpu.matmul %193, %168, %cst_77 {dimension_numbers = #tpu.dot_dimension_numbers<[0], [0], [1], [1], [0, 1, 1, 1], [], []>} : vector<8x16xf32>, vector<8x8xf32>, vector<16x8xf32> -> vector<16x8xf32>
    %c24 = arith.constant 24 : index
    %c0_78 = arith.constant 0 : index
    %196 = vector.load %arg9[%c24, %c0_78] : memref<32x32xf32, #tpu.memory_space<vmem>>, vector<8x32xf32>
    %cst_79 = arith.constant dense<0.000000e+00> : vector<8x32xf32>
    %197 = tpu.matmul %194, %196, %cst_79 {dimension_numbers = #tpu.dot_dimension_numbers<[1], [0], [0], [1], [0, 0, 1, 1], [], []>} : vector<8x8xf32>, vector<8x32xf32>, vector<8x32xf32> -> vector<8x32xf32>
    %198 = arith.addf %163, %197 : vector<8x32xf32>
    %c24_80 = arith.constant 24 : index
    %c0_81 = arith.constant 0 : index
    %199 = vector.load %arg11[%c24_80, %c0_81] : memref<32x32xf32, #tpu.memory_space<vmem>>, vector<8x32xf32>
    %cst_82 = arith.constant dense<0.000000e+00> : vector<16x32xf32>
    %200 = tpu.matmul %195, %199, %cst_82 {dimension_numbers = #tpu.dot_dimension_numbers<[1], [0], [0], [1], [0, 0, 1, 1], [], []>} : vector<16x8xf32>, vector<8x32xf32>, vector<16x32xf32> -> vector<16x32xf32>
    %201 = arith.addf %166, %200 : vector<16x32xf32>
    %c0_83 = arith.constant 0 : index
    %c0_84 = arith.constant 0 : index
    %202 = vector.load %arg10[%c0_83, %c0_84] : memref<1x32xf32, #tpu.memory_space<vmem>>, vector<1x32xf32>
    %203 = vector.broadcast %202 : vector<1x32xf32> to vector<8x32xf32>
    %204 = arith.addf %198, %203 : vector<8x32xf32>
    %c0_85 = arith.constant 0 : index
    %c0_86 = arith.constant 0 : index
    %c0_87 = arith.constant 0 : index
    %205 = vector.load %arg13[%c0_85, %c0_86, %c0_87] : memref<1x8x32xf32, #tpu.memory_space<vmem>>, vector<1x8x32xf32>
    %206 = vector.shape_cast %205 : vector<1x8x32xf32> to vector<8x32xf32>
    %207 = vector.shape_cast %204 : vector<8x32xf32> to vector<1x8x32xf32>
    tpu.vector_store %arg13[%c0_85, %c0_86, %c0_87], %207 {strides = array<i32>} : memref<1x8x32xf32, #tpu.memory_space<vmem>>, vector<1x8x32xf32>,
    %c0_88 = arith.constant 0 : index
    %c0_89 = arith.constant 0 : index
    %208 = vector.load %arg12[%c0_88, %c0_89] : memref<1x32xf32, #tpu.memory_space<vmem>>, vector<1x32xf32>
    %209 = vector.broadcast %208 : vector<1x32xf32> to vector<16x32xf32>
    %210 = arith.addf %201, %209 : vector<16x32xf32>
    %c0_90 = arith.constant 0 : index
    %c0_91 = arith.constant 0 : index
    %c0_92 = arith.constant 0 : index
    %211 = vector.load %arg14[%c0_90, %c0_91, %c0_92] : memref<1x16x32xf32, #tpu.memory_space<vmem>>, vector<1x16x32xf32>
    %212 = vector.shape_cast %211 : vector<1x16x32xf32> to vector<16x32xf32>
    %213 = vector.shape_cast %210 : vector<16x32xf32> to vector<1x16x32xf32>
    tpu.vector_store %arg14[%c0_90, %c0_91, %c0_92], %213 {strides = array<i32>} : memref<1x16x32xf32, #tpu.memory_space<vmem>>, vector<1x16x32xf32>,
    return
  }
  func.func @transform_0(%arg0: i32) -> (i32, i32, i32) {
    %c0_i32 = arith.constant 0 : i32
    %c0_i32_0 = arith.constant 0 : i32
    %c0_i32_1 = arith.constant 0 : i32
    return %arg0, %c0_i32, %c0_i32_0 : i32, i32, i32
  }
  func.func @transform_1(%arg0: i32) -> (i32, i32, i32) {
    %c0_i32 = arith.constant 0 : i32
    %c0_i32_0 = arith.constant 0 : i32
    %c0_i32_1 = arith.constant 0 : i32
    return %arg0, %c0_i32, %c0_i32_0 : i32, i32, i32
  }
  func.func @transform_2(%arg0: i32) -> (i32, i32) {
    %c0_i32 = arith.constant 0 : i32
    %c0_i32_0 = arith.constant 0 : i32
    %c0_i32_1 = arith.constant 0 : i32
    return %c0_i32, %c0_i32_0 : i32, i32
  }
  func.func @transform_3(%arg0: i32) -> (i32, i32) {
    %c0_i32 = arith.constant 0 : i32
    %c0_i32_0 = arith.constant 0 : i32
    %c0_i32_1 = arith.constant 0 : i32
    return %c0_i32, %c0_i32_0 : i32, i32
  }
  func.func @transform_4(%arg0: i32) -> (i32, i32) {
    %c0_i32 = arith.constant 0 : i32
    %c0_i32_0 = arith.constant 0 : i32
    %c0_i32_1 = arith.constant 0 : i32
    return %c0_i32, %c0_i32_0 : i32, i32
  }
  func.func @transform_5(%arg0: i32) -> (i32, i32) {
    %c0_i32 = arith.constant 0 : i32
    %c0_i32_0 = arith.constant 0 : i32
    %c0_i32_1 = arith.constant 0 : i32
    return %c0_i32, %c0_i32_0 : i32, i32
  }
  func.func @transform_6(%arg0: i32) -> (i32, i32) {
    %c0_i32 = arith.constant 0 : i32
    %c0_i32_0 = arith.constant 0 : i32
    %c0_i32_1 = arith.constant 0 : i32
    return %c0_i32, %c0_i32_0 : i32, i32
  }
  func.func @transform_7(%arg0: i32) -> (i32, i32) {
    %c0_i32 = arith.constant 0 : i32
    %c0_i32_0 = arith.constant 0 : i32
    %c0_i32_1 = arith.constant 0 : i32
    return %c0_i32, %c0_i32_0 : i32, i32
  }
  func.func @transform_8(%arg0: i32) -> (i32, i32) {
    %c0_i32 = arith.constant 0 : i32
    %c0_i32_0 = arith.constant 0 : i32
    %c0_i32_1 = arith.constant 0 : i32
    return %c0_i32, %c0_i32_0 : i32, i32
  }
  func.func @transform_9(%arg0: i32) -> (i32, i32) {
    %c0_i32 = arith.constant 0 : i32
    %c0_i32_0 = arith.constant 0 : i32
    %c0_i32_1 = arith.constant 0 : i32
    return %c0_i32, %c0_i32_0 : i32, i32
  }
  func.func @transform_10(%arg0: i32) -> (i32, i32) {
    %c0_i32 = arith.constant 0 : i32
    %c0_i32_0 = arith.constant 0 : i32
    %c0_i32_1 = arith.constant 0 : i32
    return %c0_i32, %c0_i32_0 : i32, i32
  }
  func.func @transform_11(%arg0: i32) -> (i32, i32) {
    %c0_i32 = arith.constant 0 : i32
    %c0_i32_0 = arith.constant 0 : i32
    %c0_i32_1 = arith.constant 0 : i32
    return %c0_i32, %c0_i32_0 : i32, i32
  }
  func.func @transform_12(%arg0: i32) -> (i32, i32, i32) {
    %c0_i32 = arith.constant 0 : i32
    %c0_i32_0 = arith.constant 0 : i32
    %c0_i32_1 = arith.constant 0 : i32
    return %arg0, %c0_i32, %c0_i32_0 : i32, i32, i32
  }
  func.func @transform_13(%arg0: i32) -> (i32, i32, i32) {
    %c0_i32 = arith.constant 0 : i32
    %c0_i32_0 = arith.constant 0 : i32
    %c0_i32_1 = arith.constant 0 : i32
    return %arg0, %c0_i32, %c0_i32_0 : i32, i32, i32
  }
}

</mosaic_0001>

<bundles_post_ra>
// kernel: tpu_custom_call.1
= control target key start
LH: loop header
LB: loop body
LE: loop exit
PB: predicated region body
PF: predicated region fallthrough
CT: control target
= control target key end

     0   :  { %s4225_s0 = inlined_call_operand.hbm [shape: f32[2,8,32], index: 0, kind: input, shape index: {}]   ;;  %s4226_s1 = inlined_call_operand.hbm [shape: f32[2,16,32], index: 1, kind: input, shape index: {}]   ;;  %s4227_s2 = inlined_call_operand.vmem [shape: f32[1,32], index: 2, kind: input, shape index: {}]   ;;  %s4228_s3 = inlined_call_operand.vmem [shape: f32[1,32], index: 3, kind: input, shape index: {}]   ;;  %s4229_s4 = inlined_call_operand.vmem [shape: f32[1,32], index: 4, kind: input, shape index: {}]   ;;  %s4230_s5 = inlined_call_operand.vmem [shape: f32[1,32], index: 5, kind: input, shape index: {}]   ;;  %s4231_s6 = inlined_call_operand.hbm [shape: f32[32,64], index: 6, kind: input, shape index: {}]   ;;  %s4232_s7 = inlined_call_operand.hbm [shape: f32[32,64], index: 7, kind: input, shape index: {}]   ;;  %s4233_s8 = inlined_call_operand.hbm [shape: f32[32,32], index: 8, kind: input, shape index: {}]   ;;  %s4234_s9 = inlined_call_operand.vmem [shape: f32[1,32], index: 9, kind: input, shape index: {}]   ;;  %s4235_s10 = inlined_call_operand.vmem [shape: f32[32,32], index: 10, kind: input, shape index: {}]   ;;  %s4236_s11 = inlined_call_operand.vmem [shape: f32[1,32], index: 11, kind: input, shape index: {}]   ;;  %s4237_s12 = inlined_call_operand.hbm [shape: f32[2,8,32], index: 12, kind: output, shape index: {0}]   ;;  %s4238_s13 = inlined_call_operand.hbm [shape: f32[2,16,32], index: 13, kind: output, shape index: {1}]  }
   0x1   :  { %4249 = sst [smem:[#allocation22_spill]] %s4225_s0 }
   0x2   :  { %4250 = sst [smem:[#allocation23_spill]] %s4231_s6 }
   0x3   :  { %4251 = sst [smem:[#allocation24_spill]] %s4234_s9 }
   0x4   :  { %4252 = sst [smem:[#allocation25_spill]] %s4235_s10 }
   0x5   :  { %4253 = sst [smem:[#allocation26_spill]] %s4236_s11 }
   0x6   :  { %4254 = sst [smem:[#allocation27_spill]] %s4237_s12 }
   0x7   :  { %4255 = sst [smem:[#allocation28_spill]] %s4238_s13 }
   0x8   :  { %19 = vsyncpa [#allocation3], 0 }
   0x9   :  { %21 = vsyncpa [#allocation3 + $0x1], 0 }
   0xa   :  { %22 = vsyncpa [#allocation6], 0 }
   0xb   :  { %24 = vsyncpa [#allocation6 + $0x1], 0 }
   0xc   :  { %25 = vsyncpa [#allocation9], 0 }
   0xd   :  { %26 = vsyncpa [#allocation4], 0 }
   0xe   :  { %28 = vsyncpa [#allocation4 + $0x1], 0 }
   0xf   :  { %29 = vsyncpa [#allocation13], 0 }
  0x10   :  { %31 = vsyncpa [#allocation13 + $0x1], 0  ;;  %s3702_s25 = smov 0   ;;  %s3704_s26 = smov 0  }
  0x11   :  { %s3706_s27 = smov 0   ;;  %s3708_s28 = smov 0  }
  0x12 LB: > { %4256 = sst [smem:[#allocation20_spill]] %s3597_s25  ;;  %s3723_s29 = sadd.s32 4294967295, %s3609_s28   ;;  %s3609_s28 = sphi %s3708_s28, %s4290_s28   ;;  %s3605_s27 = sphi %s3706_s27, %s4289_s27   ;;  %s3601_s26 = sphi %s3704_s26, %s4288_s26   ;;  %s3597_s25 = sphi %s3702_s25, %s4287_s25  }
  0x13   : > { %s2855_s30 = sadd.s32 4294967294, %s3609_s28   ;;  %p57_p0 = scmp.ne.s32.totalorder %s3601_s26, %s3597_s25 }
  0x14   : > { %p4242_p1 = scmp.eq.s32.totalorder %s3723_s29, 0  ;;  %p323_p3 = scmp.eq.s32.totalorder %s2855_s30, 1 }
  0x15   : > { %p2856_p5 = scmp.ge.s32.totalorder %s3609_s28, 1  ;;  %p356_p7 = scmp.lt.s32.totalorder %s3609_s28, 3 }
  0x16   : > { %p3732_p4 = por %p4242_p1, %p57_p0  ;;  %p3737_p6 = por %p323_p3, %p57_p0 }
  0x17   : > { %p3742_p8 = pnand %p2856_p5, %p356_p7  ;;  %s3611_s17 = smov [#allocation7]  }
  0x18   : > { %s4257_s14 = scalar_select %p3732_p4, 1, 0 }
  0x19   : > { %s4258_s15 = scalar_select %p3737_p6, 1, 0 }
  0x1a   : > { %s4260_s16 = scalar_select %p3742_p8, 1, 0 }
  0x1b   : > { %4259 = sst [smem:[#allocation21_spill]] %s4258_s15  ;;  %s380_s18 = sshll.u32 %s3611_s17, 4  ;;  %s3746_s18 = int_to_ptr.vmem [resolvable:$true] %s380_s18 }
  0x1c   : > { %p3201_p9 = pneg %p3742_p8  ;;  %s3612_s20 = smov [#allocation8]  }
  0x1d   : > { %s393_s21 = sshll.u32 %s3612_s20, 4  ;;  %s3613_s22 = smov [#allocation10]   ;;  %s3757_s21 = int_to_ptr.vmem [resolvable:$true] %s393_s21 }
  0x1e   : > { %p3753_p11 = pnand %p3201_p9, %p4242_p1  ;;  %s3759_s23 = sshll.u32 %s3613_s22, 4  ;;  %s407_s23 = int_to_ptr.vmem [resolvable:$true] %s3759_s23 }
  0x1f   : > { %s4262_s6 = sld [smem:[#allocation23_spill]] }
  0x20   : > { %p3769_p13 = pneg %p3753_p11 }
  0x25   : > { %s3355_s17 = scalar_lea.hbm %s4262_s6, 512 }
  0x26   : > { %p3356_p12 = scmp.ne.s32.totalorder %s4262_s6, %s3355_s17  ;;  %p3362_p5 = scmp.lt.u32.totalorder %s3355_s17, %s4262_s6 }
  0x28   : > { %p3358_p0 = pnand %p3769_p13, %p3356_p12 }
  0x2a   : > { %p3359_p3 = pneg %p3358_p0 }
  0x2c   : > { %p3364_p7 = pnand %p3362_p5, %p3359_p3 }
  0x2e   : > { %3367 = shalt.err (!%p3364_p7)
}
  0x2f   : > { %s3368_s25 = scalar_lea.vmem %s3746_s18, 512  ;;  %p3376_p2 = scmp.lt.s32.totalorder %s3746_s18, %s3746_s18 }
  0x30   : > { %p3369_p9 = scmp.ne.s32.totalorder %s3746_s18, %s3368_s25  ;;  %p3377_p6 = scmp.lt.s32.totalorder %s3368_s25, %s3368_s25 }
  0x32   : > { %p3371_p10 = pnand %p3369_p9, %p3769_p13  ;;  %p3378_p12 = por %p3377_p6, %p3376_p2 }
  0x34   : > { %p3372_p1 = pneg %p3371_p10 }
  0x36   : > { %p3379_p0 = pnand %p3378_p12, %p3372_p1 }
  0x38   : > { %3382 = shalt.err (!%p3379_p0)
}
  0x39   : > { %s4247_s15 = smov 128   ;;  %s4248_s24 = smov 8  }
  0x3a   : > { %3204 = dma.hbm_to_vmem [thread:$0]  (!%p3753_p11), %s4262_s6, 512, %s3746_s18, [#allocation6], %s4247_s15, %s4247_s15, %s4248_s24  }
  0x3b   : > { %s3383_s25 = scalar_lea.hbm %s4232_s7, 512 }
  0x3c   : > { %p3384_p1 = scmp.ne.s32.totalorder %s4232_s7, %s3383_s25  ;;  %p3390_p10 = scmp.lt.u32.totalorder %s3383_s25, %s4232_s7 }
  0x3e   : > { %p3386_p2 = pnand %p3384_p1, %p3769_p13 }
  0x40   : > { %p3387_p6 = pneg %p3386_p2 }
  0x42   : > { %p3392_p3 = pnand %p3390_p10, %p3387_p6 }
  0x44   : > { %3395 = shalt.err (!%p3392_p3)
}
  0x45   : > { %s3396_s18 = scalar_lea.vmem %s3757_s21, 512  ;;  %p3404_p12 = scmp.lt.s32.totalorder %s3757_s21, %s3757_s21 }
  0x46   : > { %p3397_p5 = scmp.ne.s32.totalorder %s3757_s21, %s3396_s18  ;;  %p3405_p0 = scmp.lt.s32.totalorder %s3396_s18, %s3396_s18 }
  0x48   : > { %p3399_p7 = pnand %p3397_p5, %p3769_p13  ;;  %p3406_p1 = por %p3405_p0, %p3404_p12 }
  0x4a   : > { %p3400_p9 = pneg %p3399_p7 }
  0x4c   : > { %p3407_p2 = pnand %p3406_p1, %p3400_p9 }
  0x4e   : > { %3410 = shalt.err (!%p3407_p2)
}
  0x4f   : > { %3207 = dma.hbm_to_vmem [thread:$0]  (!%p3753_p11), %s4232_s7, 512, %s3757_s21, [#allocation9], %s4247_s15, %s4247_s15, %s4248_s24  }
  0x50   : > { %s3411_s30 = scalar_lea.hbm %s4233_s8, 512 }
  0x51   : > { %p3412_p6 = scmp.ne.s32.totalorder %s4233_s8, %s3411_s30  ;;  %p3418_p5 = scmp.lt.u32.totalorder %s3411_s30, %s4233_s8 }
  0x53   : > { %p3414_p10 = pnand %p3412_p6, %p3769_p13 }
  0x55   : > { %p3415_p3 = pneg %p3414_p10 }
  0x57   : > { %p3420_p7 = pnand %p3418_p5, %p3415_p3 }
  0x59   : > { %3423 = shalt.err (!%p3420_p7)
}
  0x5a   : > { %s3424_s18 = scalar_lea.vmem %s407_s23, 512  ;;  %p3432_p1 = scmp.lt.s32.totalorder %s407_s23, %s407_s23 }
  0x5b   : > { %p3425_p9 = scmp.ne.s32.totalorder %s407_s23, %s3424_s18  ;;  %p3433_p2 = scmp.lt.s32.totalorder %s3424_s18, %s3424_s18 }
  0x5d   : > { %p3427_p12 = pnand %p3425_p9, %p3769_p13  ;;  %p3434_p4 = por %p3433_p2, %p3432_p1 }
  0x5f   : > { %p3428_p0 = pneg %p3427_p12 }
  0x61   : > { %p3435_p8 = pnand %p3434_p4, %p3428_p0 }
  0x63   : > { %3438 = shalt.err (!%p3435_p8)
}
  0x64   : > { %3210 = dma.hbm_to_vmem [thread:$0]  (!%p3753_p11), %s4233_s8, 512, %s407_s23, [#allocation9], %s4247_s15, %s4247_s15, %s4248_s24  }
  0x65   : > { %s3842_s13 = sadd.s32 1, %s3609_s28   ;;  %s44_s10 = sadd.s32 1, %s3605_s27 }
  0x66   : > { %s41_s19 = ssub.s32 %s3609_s28, %s3842_s13  ;;  %p51_p8 = scmp.ne.s32.totalorder %s3605_s27, %s3601_s26 }
  0x67   : > { %p42_p4 = scmp.eq.s32.totalorder %s41_s19, 0  ;;  %p52_p13 = scmp.eq.s32.totalorder %s3609_s28, 0 }
  0x68   : > { %p3228_p6 = scmp.lt.s32.totalorder %s3609_s28, 2  ;;  %p4264_p3 = scmp.eq.s32.totalorder %s3723_s29, 1 }
  0x69   : > { %s3852_s11 = scalar_select %p42_p4, %s3605_s27, %s44_s10  }
  0x6a   : > { %p53_p10 = por %p52_p13, %p51_p8  ;;  %p3856_p5 = por %p4264_p3, %p51_p8 }
  0x6b   : > { %s3861_s30 = sand.u32 1, %s3605_s27   ;;  %s2862_s23 = sshll.u32 %s3609_s28, 7 }
  0x6c   : > { %s2861_s17 = sshll.u32 %s3861_s30, 3  ;;  %s4266_s0 = sld [smem:[#allocation22_spill]] }
  0x6d   : > { %s433_s18 = scalar_lea.vmem [#allocation2], %s2861_s17  ;;  %p3870_p11 = pnand %p3228_p6, %p53_p10 }
  0x6e   : > { %s440_s21 = sshll.u32 %s433_s18, 4  ;;  %s2863_s19 = sshll.u32 %s3861_s30, 4  ;;  %s3874_s21 = int_to_ptr.vmem [resolvable:$true] %s440_s21 }
  0x6f   : > { %s430_s10 = scalar_lea.sflag [#allocation3], %s3861_s30  ;;  %p3441_p9 = pneg %p3870_p11 }
  0x72   : > { %s3868_s25 = scalar_lea.hbm %s4266_s0, %s2862_s23  ;;  %s3444_s20 = scalar_lea.hbm %s4266_s0, 256 }
  0x73   : > { %s3439_s15 = scalar_lea.hbm %s3868_s25, 128  ;;  %p3445_p1 = scmp.lt.u32.totalorder %s3868_s25, %s4266_s0 }
  0x74   : > { %p3440_p7 = scmp.ne.s32.totalorder %s3868_s25, %s3439_s15  ;;  %p3446_p2 = scmp.lt.u32.totalorder %s3444_s20, %s3439_s15 }
  0x75   : > { %p3448_p8 = scmp.lt.u32.totalorder %s3439_s15, %s3868_s25 }
  0x76   : > { %p3442_p12 = pnand %p3441_p9, %p3440_p7  ;;  %p3447_p4 = por %p3446_p2, %p3445_p1 }
  0x78   : > { %p3443_p0 = pneg %p3442_p12  ;;  %p3449_p13 = por %p3448_p8, %p3447_p4 }
  0x7a   : > { %p3450_p6 = pnand %p3449_p13, %p3443_p0 }
  0x7c   : > { %3453 = shalt.err (!%p3450_p6)
}
  0x7d   : > { %s3454_s24 = scalar_lea.vmem %s3874_s21, 128  ;;  %s3616_s23 = smov [#allocation2]  }
  0x7e   : > { %p3455_p10 = scmp.ne.s32.totalorder %s3874_s21, %s3454_s24  ;;  %s3459_s17 = sshll.u32 %s3616_s23, 4  ;;  %s3460_s17 = int_to_ptr.vmem [resolvable:$false] %s3459_s17 }
  0x7f   : > { %s3461_s22 = scalar_lea.vmem %s3460_s17, 256  ;;  %p3462_p12 = scmp.lt.s32.totalorder %s3874_s21, %s3460_s17 }
  0x80   : > { %p3457_p3 = pnand %p3455_p10, %p3441_p9  ;;  %p3463_p1 = scmp.lt.s32.totalorder %s3461_s22, %s3454_s24 }
  0x82   : > { %p3458_p7 = pneg %p3457_p3  ;;  %p3464_p2 = por %p3463_p1, %p3462_p12 }
  0x84   : > { %p3465_p4 = pnand %p3464_p2, %p3458_p7 }
  0x86   : > { %3468 = shalt.err (!%p3465_p4)
}
  0x87   : > { %3214 = dma.hbm_to_vmem [thread:$0]  (!%p3870_p11), %s3868_s25, 128, %s3874_s21, %s430_s10  }
  0x88   : > { %s451_s15 = scalar_lea.vmem [#allocation5], %s2863_s19  ;;  %s447_s18 = sand.u32 1, %s3609_s28  }
  0x89   : > { %s458_s20 = sshll.u32 %s451_s15, 4  ;;  %s2926_s23 = sshll.u32 %s3609_s28, 8  ;;  %s3906_s20 = int_to_ptr.vmem [resolvable:$true] %s458_s20 }
  0x8a   : > { %s3912_s22 = scalar_lea.hbm %s4226_s1, %s2926_s23  ;;  %s3914_s0 = scalar_lea.sflag [#allocation6], %s447_s18 }
  0x8b   : > { %s3469_s6 = scalar_lea.hbm %s3912_s22, 256  ;;  %s3474_s21 = scalar_lea.hbm %s4226_s1, 512 }
  0x8c   : > { %p3470_p0 = scmp.ne.s32.totalorder %s3912_s22, %s3469_s6  ;;  %p3475_p6 = scmp.lt.u32.totalorder %s3912_s22, %s4226_s1 }
  0x8d   : > { %p3476_p10 = scmp.lt.u32.totalorder %s3474_s21, %s3469_s6  ;;  %p3478_p7 = scmp.lt.u32.totalorder %s3469_s6, %s3912_s22 }
  0x8e   : > { %p3472_p8 = pnand %p3470_p0, %p3441_p9 }
  0x8f   : > { %p3477_p3 = por %p3476_p10, %p3475_p6 }
  0x90   : > { %p3473_p13 = pneg %p3472_p8 }
  0x91   : > { %p3479_p12 = por %p3478_p7, %p3477_p3 }
  0x93   : > { %p3480_p1 = pnand %p3479_p12, %p3473_p13 }
  0x95   : > { %3483 = shalt.err (!%p3480_p1)
}
  0x96   : > { %s3484_s15 = scalar_lea.vmem %s3906_s20, 256  ;;  %s3617_s18 = smov [#allocation5]  }
  0x97   : > { %p3485_p2 = scmp.ne.s32.totalorder %s3906_s20, %s3484_s15  ;;  %s3489_s23 = sshll.u32 %s3617_s18, 4  ;;  %s3490_s23 = int_to_ptr.vmem [resolvable:$false] %s3489_s23 }
  0x98   : > { %s3491_s24 = scalar_lea.vmem %s3490_s23, 512  ;;  %p3492_p8 = scmp.lt.s32.totalorder %s3906_s20, %s3490_s23 }
  0x99   : > { %p3487_p4 = pnand %p3485_p2, %p3441_p9  ;;  %p3493_p6 = scmp.lt.s32.totalorder %s3491_s24, %s3484_s15 }
  0x9b   : > { %p3488_p0 = pneg %p3487_p4  ;;  %p3494_p10 = por %p3493_p6, %p3492_p8 }
  0x9d   : > { %p3495_p3 = pnand %p3494_p10, %p3488_p0 }
  0x9f   : > { %3498 = shalt.err (!%p3495_p3)
}
  0xa0   : > { %s4268_s6 = smov 8   ;;  %s4269_s17 = smov 128  }
  0xa1   : > { %3217 = dma.hbm_to_vmem [thread:$0]  (!%p3870_p11), %s3912_s22, 256, %s3906_s20, %s3914_s0, %s4269_s17, %s4269_s17, %s4268_s6  }
  0xa2   : > { %p4270_p9 = scmp.ne.s32.totalorder %s4260_s16, 0 }
  0xa3   : > { %s3946_s30 = sand.u32 (!%p4270_p9), 1, %s3601_s26   ;;  %p4271_p13 = scmp.ne.s32.totalorder (!%p4270_p9), %s4257_s14, 0 }
  0xa4   : > { %470 = sbr.rel (%p4270_p9) target bundleno = 3033 (0xbd9), region = 68  ;;  %s2867_s25 = sshll.u32 (!%p4270_p9), %s3946_s30, 3 }
  0xa5   : > { %s473_s21 = scalar_lea.sflag (!%p4270_p9), [#allocation3], %s3946_s30  ;;  %s476_s9 = scalar_lea.vmem (!%p4270_p9), [#allocation2], %s2867_s25 }
  0xab   : > { %3572 = dma.done.wait (%p4271_p13), %s473_s21, 128  }
  0xac   : > { %3574 = vsyncadd (%p4271_p13), %s473_s21, 4294967168  ;;  %s481_s0 = sand.u32 1, %s3723_s29   ;;  %s2868_s16 = sshll.u32 %s3946_s30, 4 }
  0xad   : > { %s482_s20 = scalar_lea.sflag [#allocation6], %s481_s0  ;;  %s485_s22 = scalar_lea.vmem [#allocation5], %s2868_s16 }
  0xae   : > { %3576 = dma.done.wait (%p4271_p13), %s482_s20, 256  }
  0xaf   : > { %3578 = vsyncadd (%p4271_p13), %s482_s20, 4294967040  ;;  %p4272_p11 = scmp.eq.s32.totalorder %s3723_s29, 0 }
  0xb1   : > { %3580 = dma.done.wait (%p4272_p11), [#allocation6], 512   ;;  %p4273_p7 = pmov %p4272_p11 }
  0xb3   : > { %3582 = vsyncadd (%p4273_p7), [#allocation6], 4294966784  ;;  %p4274_p12 = pmov %p4273_p7 }
  0xb4   : > { %p4275_p1 = pmov %p4273_p7 }
  0xb5   : > { %3584 = dma.done.wait (%p4274_p12), [#allocation9], 1024  }
  0xb6   : > { %3586 = vsyncadd (%p4275_p1), [#allocation9], 4294966272  ;;  %vm553_vm0 = vcmask 261120   ;;  %v582_v0 = vld [vmem:[%s485_s22] sm:$0xff]  ;;  %v583_v1 = vld [vmem:[%s485_s22 + $0x8] sm:$0xff]  ;;  %v3618_v24 = vmov 0.0|0.0  }
  0xb7   : > { %v550_v2 = vld [vmem:[%s476_s9] sm:$0xff]  ;;  %v586_v3 = vsel %vm553_vm0, %v582_v0, 0.0  ;;  %v589_v5 = vsel %vm553_vm0, %v583_v1, 0.0  ;;  %v705_v21 = vld [vmem:[#allocation8] sm:$0xff]  ;;  %v706_v22 = vld [vmem:[#allocation8 + $0x8] sm:$0xff]  ;;  %3133 = vmatprep.subr.bf16.mxu0 %v3618_v24  ;;  %vm3619_vm1 = vmmov 0  }
  0xb8   : > { %v554_v4 = vsel %vm553_vm0, %v550_v2, 0.0  ;;  %587 = vadd.xlane.f32.xlu0 %v586_v3  ;;  %v628_v23 = vld [vmem:[#allocation7] sm:$0xff]  ;;  %v3139_v25 = vpack.c.bf16 %v706_v22, %v705_v21  ;;  %v629_v26 = vld [vmem:[#allocation7 + $0x8] sm:$0xff]  ;;  %v707_v27 = vld [vmem:[#allocation8 + $0x10] sm:$0xff]  ;;  %v3620_v34 = vmov 0.0   ;;  %vm790_vm2 = vcmask 64512  }
  0xb9   : > { %555 = vadd.xlane.f32.xlu1 %v554_v4  ;;  %v708_v28 = vld [vmem:[#allocation8 + $0x18] sm:$0xff]  ;;  %v3134_v29 = vpack.c.bf16 %v629_v26, %v628_v23  ;;  %v630_v31 = vld [vmem:[#allocation7 + $0x10] sm:$0xff]  ;;  %3003 = vmatprep.mubr.msk.f32.mxu0 %vm3619_vm1, %v3620_v34  ;;  %vm4007_vm3 = vmpackc.low %vm790_vm2, %vm790_vm2  ;;  %s3621_s17 = smov 120   ;;  %vm871_vm4 = vcmask 130048   ;;  %s3622_s21 = smov 96  }
  0xba   : > { %v3143_v30 = vpack.c.bf16 %v708_v28, %v707_v27  ;;  %3140 = vmatprep.subr.bf16.mxu1 %v3139_v25  ;;  %v631_v32 = vld [vmem:[#allocation7 + $0x18] sm:$0xff]  ;;  %v2876_v45 = vld [vmem:[%s4229_s4] ss:$0 sm:$0xff]  ;;  %s3623_s9 = smov 88   ;;  %s3624_s0 = smov 112  }
  0xbb   : > { %3135 = vmatpush3.bf16.msra.mxu0 %v3134_v29  ;;  %3142 = vmatpush3.bf16.msra.mxu1 %v3139_v25  ;;  %v3137_v33 = vpack.c.bf16 %v631_v32, %v630_v31  ;;  %v2877_v47 = vld [vmem:[%s4230_s5] ss:$0 sm:$0xff]  ;;  %s3625_s20 = smov 104   ;;  %s3626_s22 = smov 80  }
  0xbc   : > { %590 = vadd.xlane.f32.xlu0 %v589_v5  ;;  %3136 = vmatprep.subr.bf16.mxu0 %v3618_v24  ;;  %v2874_v53 = vld [vmem:[%s4227_s2] ss:$0 sm:$0xff]  ;;  %s4278_s10 = sld [smem:[#allocation25_spill]]  ;;  %s3627_s6 = smov 72  }
  0xbd   : > { %3144 = vmatprep.subr.bf16.mxu1 %v3143_v30  ;;  %v2875_v56 = vld [vmem:[%s4228_s3] ss:$0 sm:$0xff]  ;;  %s4279_s14 = sld [smem:[#allocation24_spill]]  ;;  %s2921_s19 = sshll.u32 %s3723_s29, 7 }
  0xbe   : > { %v2022_v63 = vld [vmem:[#allocation10 + $0x10] sm:$0xff]  ;;  %s542_s15 = scalar_lea.vmem [#allocation11], %s2867_s25  ;;  %s4280_s24 = sld [smem:[#allocation26_spill]] }
  0xbf   : > { %3146 = vmatpush3.bf16.msra.mxu1 %v3143_v30  ;;  %3138 = vmatpush3.bf16.msra.mxu0 %v3137_v33  ;;  %s2686_s18 = sshll.u32 %s542_s15, 4  ;;  %s4282_s23 = sld [smem:[#allocation28_spill]]  ;;  %s4149_s18 = int_to_ptr.vmem [resolvable:$true] %s2686_s18 }
  0xc0   : > { %3151 = vmatprep.subr.bf16.mxu1 %v3618_v24  ;;  %3147 = vmatprep.subr.bf16.mxu0 %v3618_v24 }
 0x145   : > { %v588_v6 = vpop.xlane.xlu0 %587 }
 0x146   : > { %v556_v7 = vpop.xlane.xlu1 %555  ;;  %v592_v8 = vmul.f32 0.03125, %v588_v6 }
 0x147   : > { %v558_v9 = vmul.f32 0.03125, %v556_v7 }
 0x148   : > { %v594_v10 = vsub.f32 %v582_v0, %v592_v8 }
 0x149   : > { %v559_v11 = vsub.f32 %v550_v2, %v558_v9  ;;  %v591_v12 = vpop.xlane.xlu0 %590 }
 0x14a   : > { %v593_v13 = vmul.f32 0.03125, %v591_v12  ;;  %v596_v14 = vmul.f32 %v594_v10, %v594_v10 }
 0x14b   : > { %v560_v15 = vmul.f32 %v559_v11, %v559_v11 }
 0x14c   : > { %v595_v16 = vsub.f32 %v583_v1, %v593_v13  ;;  %v598_v17 = vsel %vm553_vm0, %v596_v14, 0.0 }
 0x14d   : > { %599 = vadd.xlane.f32.xlu1 %v598_v17  ;;  %v561_v19 = vsel %vm553_vm0, %v560_v15, 0.0 }
 0x14e   : > { %v597_v18 = vmul.f32 %v595_v16, %v595_v16 }
 0x150   : > { %v601_v20 = vsel %vm553_vm0, %v597_v18, 0.0 }
 0x151   : > { %602 = vadd.xlane.f32.xlu0 %v601_v20  ;;  %562 = vadd.xlane.f32.xlu1 %v561_v19 }
 0x1da   : > { %v600_v35 = vpop.xlane.xlu1 %599 }
 0x1db   : > { %v604_v36 = vmul.f32 0.03125, %v600_v35 }
 0x1dd   : > { %v606_v37 = vadd.f32 1e-05, %v604_v36 }
 0x1de   : > { %v603_v38 = vpop.xlane.xlu0 %602  ;;  %v563_v39 = vpop.xlane.xlu1 %562 }
 0x1df   : > { %3317 = vrsqrt.f32 %v606_v37  ;;  %v605_v40 = vmul.f32 0.03125, %v603_v38  ;;  %v564_v41 = vmul.f32 0.03125, %v563_v39 }
 0x1e1   : > { %v607_v42 = vadd.f32 1e-05, %v605_v40  ;;  %v565_v43 = vadd.f32 1e-05, %v564_v41 }
 0x1e3   : > { %3319 = vrsqrt.f32 %v607_v42 }
 0x1e4   : > { %3321 = vrsqrt.f32 %v565_v43 }
 0x1e9   : > { %v3318_v44 = vpop.eup %3317 }
 0x1ea   : > { %v610_v46 = vmul.f32 %v3318_v44, %v594_v10 }
 0x1ec   : > { %v618_v48 = vmul.f32 %v2876_v45, %v610_v46 }
 0x1ed   : > { %v3320_v49 = vpop.eup %3319 }
 0x1ee   : > { %v3322_v50 = vpop.eup %3321  ;;  %v611_v51 = vmul.f32 %v3320_v49, %v595_v16  ;;  %v626_v52 = vadd.f32 %v2877_v47, %v618_v48 }
 0x1ef   : > { %v567_v54 = vmul.f32 %v3322_v50, %v559_v11 }
 0x1f0   : > { %v619_v55 = vmul.f32 %v2876_v45, %v611_v51  ;;  %3014 = vmatprep.mubr.msk.f32.mxu1 %vm553_vm0, %v626_v52 }
 0x1f1   : > { %v574_v57 = vmul.f32 %v2874_v53, %v567_v54 }
 0x1f2   : > { %v627_v58 = vadd.f32 %v2877_v47, %v619_v55 }
 0x1f3   : > { %v581_v59 = vadd.f32 %v2875_v56, %v574_v57 }
 0x1f4   : > { %3015 = vmatmul.mubr.msk.f32.vlgmr.msra.gmra.mrb[0].mxu1 %vm553_vm0, %v627_v58 }
 0x1f5   : > { %3004 = vmatmul.mubr.msk.f32.vlgmr.msra.gmra.mrb[0].mxu0 %vm553_vm0, %v581_v59  ;;  %3028 = vmatprep.mubr.msk.f32.mxu1 %vm3619_vm1, %v3620_v34 }
 0x1f6   : > { %3021 = vmatprep.mubr.msk.f32.mxu0 %vm3619_vm1, %v3620_v34 }
 0x2c7   : > { %v3016_v60 = vpop.f32.mrb[0].mxu1 }
 0x2c8   : > { %v4003_v61 = vpop.f32.mrb[0].mxu0  ;;  %v781_v62 = vpop.f32.mrb[1].mxu1 }
 0x2c9   : > { %1098 = vrot.lane.b32.xlu1 %v4003_v61, %s3621_s17  ;;  %v3005_v0 = vpop.f32.mrb[1].mxu0  ;;  %v4012_v1 = vpack.i.bf16 %v3016_v60, %v781_v62  ;;  %v3148_v2 = vpack.c.bf16 %v3016_v60, %v781_v62 }
 0x2cb   : > { %3283 = vrot.lane.b32.xlu0 %v4012_v1, %s3621_s17  ;;  %3150 = vmatpush3.bf16.xpose.msk.msra.mxu0 %vm4007_vm3, %v3148_v2 }
 0x2cc   : > { %3154 = vmatprep.subr.bf16.mxu0 %v3618_v24 }
 0x2d2   : > { %3022 = vmatmul.mubr.msk.f32.vlgmr.msra.gmra.mrb[2].mxu0 %vm790_vm2, %v4003_v61 }
 0x2d3   : > { %3040 = vmatprep.mubr.msk.f32.mxu0 %vm3619_vm1, %v3620_v34 }
 0x33b   : > { %v1099_v7 = vpop.permute.xlu1 %1098 }
 0x33d   : > { %v3284_v3 = vpop.permute.xlu0 %3283 }
 0x33e   : > { %v3286_v4 = vunpack.i.h.bf16 %v3284_v3  ;;  %v3285_v5 = vunpack.i.l.bf16 %v3284_v3 }
 0x340   : > { %v3155_v6 = vpack.c.bf16 %v3286_v4, %v3285_v5 }
 0x342   : > { %3157 = vmatpush3.bf16.xpose.msk.msra.mxu0 %vm4007_vm3, %v3155_v6 }
 0x349   : > { %3041 = vmatmul.mubr.msk.f32.vlgmr.msra.gmra.mrb[4].mxu0 %vm790_vm2, %v1099_v7 }
 0x3a5   : > { %v866_v8 = vpop.f32.mrb[2].mxu0 }
 0x3a6   : > { %v870_v9 = vmul.f32 0.35355338, %v866_v8  ;;  %v3023_v10 = vpop.f32.mrb[3].mxu0 }
 0x3a8   : > { %v872_v11 = vsel %vm871_vm4, %v870_v9, -inf }
 0x3a9   : > { %873 = vmax.xlane.f32.xlu1 %v872_v11  ;;  %v883_v41 = vrot.slane %v872_v11, 4 }
 0x3ab   : > { %v884_v42 = vmax.f32 %v872_v11, %v883_v41 }
 0x3ad   : > { %v885_v43 = vrot.slane %v884_v42, 2 }
 0x3af   : > { %v886_v44 = vmax.f32 %v884_v42, %v885_v43 }
 0x3b1   : > { %v887_v45 = vrot.slane %v886_v44, 1 }
 0x3b3   : > { %v888_v47 = vmax.f32 %v886_v44, %v887_v45 }
 0x3b5   : > { %v889_v50 = vsub.f32 %v870_v9, %v888_v47 }
 0x3b7   : > { %v890_v51 = vmul.f32 1.442695, %v889_v50 }
 0x3ba   : > { %1012 = vrot.lane.b32.xlu1 %v4003_v61, %s3622_s21 }
 0x3be   : > { %3293 = vrot.lane.b32.xlu1 %v4012_v1, %s3623_s9 }
 0x41c   : > { %v1176_v12 = vpop.f32.mrb[4].mxu0 }
 0x41d   : > { %v1180_v13 = vmul.f32 0.35355338, %v1176_v12  ;;  %v3042_v14 = vpop.f32.mrb[5].mxu0 }
 0x41f   : > { %v1181_v15 = vsel %vm871_vm4, %v1180_v13, -inf }
 0x420   : > { %1182 = vmax.xlane.f32.xlu0 %v1181_v15  ;;  %v1192_v16 = vrot.slane %v1181_v15, 4 }
 0x422   : > { %v1193_v17 = vmax.f32 %v1181_v15, %v1192_v16 }
 0x424   : > { %v1194_v20 = vrot.slane %v1193_v17, 2 }
 0x426   : > { %v1195_v22 = vmax.f32 %v1193_v17, %v1194_v20 }
 0x428   : > { %v1196_v23 = vrot.slane %v1195_v22, 1 }
 0x42a   : > { %v1197_v25 = vmax.f32 %v1195_v22, %v1196_v23 }
 0x42c   : > { %v1198_v28 = vsub.f32 %v1180_v13, %v1197_v25 }
 0x42e   : > { %v1199_v29 = vmul.f32 1.442695, %v1198_v28  ;;  %v1405_v28 = vld [vmem:[#allocation10 + $0x8] sm:$0xff] }
 0x436   : > { %v874_v18 = vpop.xlane.xlu1 %873 }
 0x437   : > { %v875_v19 = vsub.f32 %v870_v9, %v874_v18 }
 0x439   : > { %v876_v21 = vmul.f32 1.442695, %v875_v19 }
 0x43a   : > { %v1013_v5 = vpop.permute.xlu1 %1012 }
 0x43b   : > { %3323 = vpow2.f32 %v876_v21 }
 0x43c   : > { %3325 = vpow2.f32 %v1199_v29  ;;  %v1552_v29 = vld [vmem:[%s4278_s10 + $0x8] sm:$0xff] }
 0x43d   : > { %3065 = vmatprep.subr.mxu0 %v1552_v29 }
 0x43e   : > { %v3294_v11 = vpop.permute.xlu1 %3293  ;;  %3066 = vmatpush3.msra.mxu0 %v1552_v29 }
 0x43f   : > { %v3296_v15 = vunpack.i.h.bf16 %v3294_v11  ;;  %v3295_v16 = vunpack.i.l.bf16 %v3294_v11 }
 0x441   : > { %v3159_v20 = vpack.c.bf16 %v3296_v15, %v3295_v16 }
 0x445   : > { %v3324_v26 = vpop.eup %3323 }
 0x446   : > { %v878_v27 = vsel %vm871_vm4, %v3324_v26, 0.0  ;;  %v3326_v30 = vpop.eup %3325 }
 0x447   : > { %879 = vadd.xlane.f32.xlu0 %v878_v27  ;;  %v1201_v31 = vsel %vm871_vm4, %v3326_v30, 0.0 }
 0x448   : > { %v1202_v32 = vrot.slane %v1201_v31, 4 }
 0x44a   : > { %v1203_v33 = vadd.f32 %v1202_v32, %v1201_v31 }
 0x44c   : > { %v1204_v35 = vrot.slane %v1203_v33, 2 }
 0x44e   : > { %v1205_v36 = vadd.f32 %v1204_v35, %v1203_v33  ;;  %v1096_v33 = vld [vmem:[#allocation10] sm:$0xff] }
 0x450   : > { %v1206_v37 = vrot.slane %v1205_v36, 1 }
 0x452   : > { %v1207_v38 = vadd.f32 %v1206_v37, %v1205_v36 }
 0x454   : > { %3327 = vrcp.f32 %v1207_v38 }
 0x45d   : > { %3288 = vrot.lane.b32.xlu0 %v4012_v1, %s3622_s21 }
 0x45e   : > { %v3328_v39 = vpop.eup %3327 }
 0x45f   : > { %v1209_v40 = vmul.f32 %v3328_v39, %v3326_v30  ;;  %v1097_v30 = vld [vmem:[%s4278_s10] sm:$0xff] }
 0x460   : > { %3070 = vmatprep.subr.mxu0 %v1097_v30 }
 0x461   : > { %1321 = vrot.lane.b32.xlu0 %v4003_v61, %s3623_s9  ;;  %s4129_s9 = scalar_lea.vmem [#allocation12], %s2868_s16  ;;  %s2668_s16 = scalar_lea.sflag [#allocation4], %s3946_s30 }
 0x465   : > { %3298 = vrot.lane.b32.xlu0 %v4012_v1, %s3624_s0 }
 0x469   : > { %1715 = vrot.lane.b32.xlu0 %v4003_v61, %s3624_s0  ;;  %s2699_s0 = sshll.u32 %s4129_s9, 4  ;;  %s4138_s0 = int_to_ptr.vmem [resolvable:$true] %s2699_s0 }
 0x487   : > { %1289 = vxpose.xlu0.b32.start.end [1/1] (short) (narrow) %v1209_v40, 16 }
 0x4ad   : > { %v1183_v46 = vpop.xlane.xlu0 %1182 }
 0x4ae   : > { %v1184_v48 = vsub.f32 %v1180_v13, %v1183_v46 }
 0x4b0   : > { %v1185_v49 = vmul.f32 1.442695, %v1184_v48 }
 0x4b2   : > { %3329 = vpow2.f32 %v1185_v49 }
 0x4b3   : > { %3331 = vpow2.f32 %v890_v51 }
 0x4b4   : > { %3303 = vrot.lane.b32.xlu0 %v4012_v1, %s3625_s20 }
 0x4bc   : > { %v3330_v52 = vpop.eup %3329 }
 0x4bd   : > { %v1187_v53 = vsel %vm871_vm4, %v3330_v52, 0.0  ;;  %v3332_v54 = vpop.eup %3331 }
 0x4be   : > { %1188 = vadd.xlane.f32.xlu1 %v1187_v53  ;;  %v892_v55 = vsel %vm871_vm4, %v3332_v54, 0.0 }
 0x4bf   : > { %v893_v56 = vrot.slane %v892_v55, 4 }
 0x4c1   : > { %v894_v57 = vadd.f32 %v893_v56, %v892_v55 }
 0x4c3   : > { %v895_v58 = vrot.slane %v894_v57, 2 }
 0x4c5   : > { %v896_v60 = vadd.f32 %v895_v58, %v894_v57 }
 0x4c7   : > { %v897_v3 = vrot.slane %v896_v60, 1 }
 0x4c9   : > { %v898_v6 = vadd.f32 %v897_v3, %v896_v60 }
 0x4d4   : > { %v880_v59 = vpop.xlane.xlu0 %879 }
 0x4d5   : > { %3333 = vrcp.f32 %v880_v59 }
 0x4d6   : > { %3335 = vrcp.f32 %v898_v6 }
 0x4d8   : > { %v3289_v62 = vpop.permute.xlu0 %3288 }
 0x4d9   : > { %v3291_v0 = vunpack.i.h.bf16 %v3289_v62  ;;  %v3290_v2 = vunpack.i.l.bf16 %v3289_v62 }
 0x4db   : > { %v3152_v4 = vpack.c.bf16 %v3291_v0, %v3290_v2 }
 0x4dc   : > { %v1322_v12 = vpop.permute.xlu0 %1321 }
 0x4dd   : > { %3153 = vmatpush3.bf16.msra.mxu1 %v3152_v4 }
 0x4de   : > { %3031 = vmatprep.subr.mxu1 %v1013_v5 }
 0x4df   : > { %v3334_v7 = vpop.eup %3333 }
 0x4e0   : > { %v882_v8 = vmul.f32 %v3334_v7, %v3324_v26  ;;  %v3336_v9 = vpop.eup %3335  ;;  %v3299_v14 = vpop.permute.xlu0 %3298 }
 0x4e1   : > { %v900_v10 = vmul.f32 %v3336_v9, %v3332_v54  ;;  %v3301_v37 = vunpack.i.h.bf16 %v3299_v14  ;;  %v3300_v38 = vunpack.i.l.bf16 %v3299_v14 }
 0x4e2   : > { %3029 = vmatmul.mubr.msk.f32.vlgmr.msra.gmra.mrb[2].mxu1 %vm871_vm4, %v882_v8 }
 0x4e3   : > { %3032 = vmatpush3.msra.mxu1 %v1013_v5  ;;  %v3162_v41 = vpack.c.bf16 %v3301_v37, %v3300_v38 }
 0x4e4   : > { %3158 = vmatprep.subr.bf16.mxu1 %v3618_v24  ;;  %v1716_v18 = vpop.permute.xlu0 %1715 }
 0x4f1   : > { %980 = vxpose.xlu1.b32.start.end [1/1] (short) (narrow) %v900_v10, 16 }
 0x507   : > { %v1305_v22 = vpop.trf.xlu0 }
 0x50b   : > { %v1306_v25 = vpop.trf.xlu0 }
 0x513   : > { %1938 = vrot.lane.b32.xlu1 %v4003_v61, %s3626_s22 }
 0x517   : > { %2181 = vrot.lane.b32.xlu1 %v4003_v61, %s3625_s20  ;;  %s4281_s20 = sld [smem:[#allocation27_spill]] }
 0x526   : > { %v3304_v9 = vpop.permute.xlu0 %3303 }
 0x527   : > { %v3306_v16 = vunpack.i.h.bf16 %v3304_v9 }
 0x54b   : > { %v1189_v13 = vpop.xlane.xlu1 %1188 }
 0x54c   : > { %3337 = vrcp.f32 %v1189_v13 }
 0x556   : > { %v3338_v19 = vpop.eup %3337 }
 0x557   : > { %v1191_v23 = vmul.f32 %v3338_v19, %v3330_v52 }
 0x571   : > { %v996_v17 = vpop.trf.xlu1 }
 0x572   : > { %3033 = vmatprep.mubr.msk.f32.mxu1 %vm790_vm2, %v996_v17  ;;  %v3305_v17 = vunpack.i.l.bf16 %v3304_v9 }
 0x574   : > { %v3169_v19 = vpack.c.bf16 %v3306_v16, %v3305_v17 }
 0x575   : > { %v997_v21 = vpop.trf.xlu1 }
 0x576   : > { %3034 = vmatmul.mubr.msk.f32.vlgmr.msra.gmra.mrb[4].mxu1 %vm790_vm2, %v997_v21 }
 0x577   : > { %3160 = vmatpush3.bf16.msra.mxu1 %v3159_v20  ;;  %3047 = vmatprep.mubr.msk.f32.mxu1 %vm3619_vm1, %v3620_v34 }
 0x578   : > { %3050 = vmatprep.subr.mxu1 %v1322_v12 }
 0x57a   : > { %3048 = vmatmul.mubr.msk.f32.vlgmr.msra.gmra.mrb[6].mxu1 %vm871_vm4, %v1191_v23 }
 0x57b   : > { %3051 = vmatpush3.msra.mxu1 %v1322_v12  ;;  %3052 = vmatprep.mubr.msk.f32.mxu1 %vm790_vm2, %v1305_v22 }
 0x57c   : > { %3055 = vmatprep.subr.mxu1 %v3620_v34 }
 0x57e   : > { %3053 = vmatmul.mubr.msk.f32.vlgmr.msra.gmra.mrb[8].mxu1 %vm790_vm2, %v1306_v25 }
 0x57f   : > { %3057 = vmatprep.mubr.msk.f32.mxu1 %vm3619_vm1, %v3620_v34  ;;  %3056 = vmatpush3.msra.mxu1 %v1405_v28 }
 0x580   : > { %3060 = vmatprep.subr.mxu1 %v3620_v34 }
 0x585   : > { %v1939_v42 = vpop.permute.xlu1 %1938 }
 0x589   : > { %v2182_v15 = vpop.permute.xlu1 %2181 }
 0x5b5   : > { %v976_v26 = vpop.f32.mrb[2].mxu1 }
 0x5b6   : > { %v3030_v27 = vpop.f32.mrb[3].mxu1 }
 0x649   : > { %v3035_v31 = vpop.f32.mrb[4].mxu1 }
 0x64a   : > { %v1087_v32 = vpop.f32.mrb[5].mxu1 }
 0x64d   : > { %v1285_v35 = vpop.f32.mrb[6].mxu1 }
 0x64e   : > { %v3049_v36 = vpop.f32.mrb[7].mxu1  ;;  %3058 = vmatmul.mubr.msk.f32.vlgmr.msra.gmra.mrb[10].mxu1 %vm790_vm2, %v1285_v35 }
 0x64f   : > { %3061 = vmatpush3.msra.mxu1 %v1096_v33  ;;  %3062 = vmatprep.mubr.msk.f32.mxu1 %vm3619_vm1, %v3620_v34 }
 0x650   : > { %3161 = vmatprep.subr.bf16.mxu1 %v3618_v24 }
 0x651   : > { %v3054_v39 = vpop.f32.mrb[8].mxu1 }
 0x652   : > { %v1396_v40 = vpop.f32.mrb[9].mxu1  ;;  %3063 = vmatmul.mubr.msk.f32.vlgmr.msra.gmra.mrb[12].mxu1 %vm790_vm2, %v976_v26 }
 0x653   : > { %3067 = vmatprep.mubr.msk.f32.mxu0 %vm790_vm2, %v1396_v40  ;;  %3079 = vmatprep.mubr.msk.f32.mxu1 %vm3619_vm1, %v3620_v34 }
 0x654   : > { %3068 = vmatmul.mubr.msk.f32.vlgmr.msra.gmra.mrb[6].mxu0 %vm790_vm2, %v3054_v39 }
 0x655   : > { %3072 = vmatprep.mubr.msk.f32.mxu0 %vm790_vm2, %v1087_v32  ;;  %3071 = vmatpush3.msra.mxu0 %v1097_v30 }
 0x656   : > { %3164 = vmatpush3.bf16.xpose.msk.msra.mxu1 %vm4007_vm3, %v3162_v41  ;;  %3165 = vmatprep.subr.bf16.mxu0 %v3618_v24 }
 0x657   : > { %3089 = vmatprep.subr.mxu1 %v1939_v42 }
 0x65c   : > { %3073 = vmatmul.mubr.msk.f32.vlgmr.msra.gmra.mrb[6].mxu0 %vm790_vm2, %v3035_v31  ;;  %v2097_v31 = vld [vmem:[%s4278_s10 + $0x10] sm:$0xff] }
 0x65d   : > { %3080 = vmatmul.mubr.msk.f32.vlgmr.msra.gmra.mrb[14].mxu1 %vm790_vm2, %v1716_v18  ;;  %3086 = vmatprep.mubr.msk.f32.mxu0 %vm3619_vm1, %v3620_v34 }
 0x65e   : > { %3090 = vmatpush3.msra.mxu1 %v1939_v42 }
 0x65f   : > { %3168 = vmatprep.subr.bf16.mxu1 %v3618_v24 }
 0x721   : > { %v1475_v43 = vpop.f32.mrb[10].mxu1 }
 0x722   : > { %v3059_v44 = vpop.f32.mrb[11].mxu1 }
 0x725   : > { %v1548_v45 = vpop.f32.mrb[12].mxu1 }
 0x726   : > { %v4080_v46 = vadd.f32 %v1548_v45, %v1475_v43  ;;  %v3064_v47 = vpop.f32.mrb[13].mxu1 }
 0x730   : > { %v1793_v48 = vpop.f32.mrb[14].mxu1 }
 0x731   : > { %v1797_v49 = vmul.f32 0.35355338, %v1793_v48  ;;  %v3081_v50 = vpop.f32.mrb[15].mxu1 }
 0x733   : > { %v1798_v51 = vsel %vm871_vm4, %v1797_v49, -inf }
 0x734   : > { %1799 = vmax.xlane.f32.xlu0 %v1798_v51  ;;  %v1809_v52 = vrot.slane %v1798_v51, 4 }
 0x736   : > { %v1810_v53 = vmax.f32 %v1798_v51, %v1809_v52 }
 0x738   : > { %v1811_v54 = vrot.slane %v1810_v53, 2 }
 0x73a   : > { %v1812_v55 = vmax.f32 %v1810_v53, %v1811_v54 }
 0x73c   : > { %v1813_v56 = vrot.slane %v1812_v55, 1 }
 0x73e   : > { %v1814_v57 = vmax.f32 %v1812_v55, %v1813_v56 }
 0x740   : > { %v1815_v58 = vsub.f32 %v1797_v49, %v1814_v57 }
 0x742   : > { %v1816_v59 = vmul.f32 1.442695, %v1815_v58 }
 0x744   : > { %3339 = vpow2.f32 %v1816_v59 }
 0x74e   : > { %v3340_v60 = vpop.eup %3339 }
 0x74f   : > { %v1818_v62 = vsel %vm871_vm4, %v3340_v60, 0.0 }
 0x750   : > { %v1819_v0 = vrot.slane %v1818_v62, 4 }
 0x752   : > { %v1820_v2 = vadd.f32 %v1819_v0, %v1818_v62 }
 0x754   : > { %v1821_v3 = vrot.slane %v1820_v2, 2 }
 0x756   : > { %v1822_v4 = vadd.f32 %v1821_v3, %v1820_v2 }
 0x758   : > { %v1823_v5 = vrot.slane %v1822_v4, 1 }
 0x75a   : > { %v1824_v6 = vadd.f32 %v1823_v5, %v1822_v4 }
 0x75c   : > { %3341 = vrcp.f32 %v1824_v6 }
 0x766   : > { %v3342_v7 = vpop.eup %3341 }
 0x767   : > { %v1826_v8 = vmul.f32 %v3342_v7, %v3340_v60 }
 0x769   : > { %1906 = vxpose.xlu1.b32.start.end [1/1] (short) (narrow) %v1826_v8, 16 }
 0x78b   : > { %3308 = vrot.lane.b32.xlu1 %v4012_v1, %s3626_s22  ;;  %s4147_s22 = scalar_lea.hbm %s4281_s20, %s2921_s19  ;;  %s3628_s19 = smov [#allocation11]  }
 0x78c   : > { %s3503_s17 = sshll.u32 %s3628_s19, 4  ;;  %s3504_s17 = int_to_ptr.vmem [resolvable:$false] %s3503_s17 }
 0x78d   : > { %s3505_s21 = scalar_lea.vmem %s3504_s17, 256  ;;  %p3506_p8 = scmp.lt.s32.totalorder %s4149_s18, %s3504_s17 }
 0x7c1   : > { %v1800_v10 = vpop.xlane.xlu0 %1799 }
 0x7c2   : > { %v1801_v11 = vsub.f32 %v1797_v49, %v1800_v10  ;;  %v2488_v10 = vld [vmem:[#allocation10 + $0x18] sm:$0xff] }
 0x7c4   : > { %v1802_v12 = vmul.f32 1.442695, %v1801_v11 }
 0x7c6   : > { %3343 = vpow2.f32 %v1802_v12 }
 0x7d0   : > { %v3344_v13 = vpop.eup %3343 }
 0x7d1   : > { %v1804_v14 = vsel %vm871_vm4, %v3344_v13, 0.0 }
 0x7d2   : > { %1805 = vadd.xlane.f32.xlu0 %v1804_v14 }
 0x7e9   : > { %v1922_v18 = vpop.trf.xlu1 }
 0x7ea   : > { %3091 = vmatprep.mubr.msk.f32.mxu1 %vm790_vm2, %v1922_v18 }
 0x7ed   : > { %v1923_v20 = vpop.trf.xlu1 }
 0x7ee   : > { %3092 = vmatmul.mubr.msk.f32.vlgmr.msra.gmra.mrb[16].mxu1 %vm790_vm2, %v1923_v20  ;;  %v2918_v20 = vld [vmem:[%s4280_s24] ss:$0 sm:$0xff]  ;;  %s3499_s24 = scalar_lea.vmem %s4149_s18, 128 }
 0x7ef   : > { %3171 = vmatpush3.bf16.xpose.msk.msra.mxu1 %vm4007_vm3, %v3169_v19  ;;  %3108 = vmatprep.mubr.msk.f32.mxu1 %vm3619_vm1, %v3620_v34  ;;  %p3500_p2 = scmp.ne.s32.totalorder %s4149_s18, %s3499_s24  ;;  %p3507_p6 = scmp.lt.s32.totalorder %s3505_s21, %s3499_s24 }
 0x7f1   : > { %p3501_p4 = pnand %p3500_p2, %p3856_p5  ;;  %p3508_p10 = por %p3507_p6, %p3506_p8 }
 0x7f3   : > { %p3502_p0 = pneg %p3501_p4 }
 0x7f5   : > { %p3509_p3 = pnand %p3508_p10, %p3502_p0 }
 0x7f6   : > { %3109 = vmatmul.mubr.msk.f32.vlgmr.msra.gmra.mrb[18].mxu1 %vm790_vm2, %v2182_v15 }
 0x7fd   : > { %v3309_v21 = vpop.permute.xlu1 %3308 }
 0x7fe   : > { %v3311_v22 = vunpack.i.h.bf16 %v3309_v21  ;;  %v3310_v23 = vunpack.i.l.bf16 %v3309_v21 }
 0x800   : > { %v3166_v25 = vpack.c.bf16 %v3311_v22, %v3310_v23 }
 0x802   : > { %3167 = vmatpush3.bf16.msra.mxu0 %v3166_v25 }
 0x803   : > { %3094 = vmatprep.subr.mxu0 %v3620_v34 }
 0x85f   : > { %v1806_v26 = vpop.xlane.xlu0 %1805 }
 0x860   : > { %3345 = vrcp.f32 %v1806_v26 }
 0x86a   : > { %v3346_v27 = vpop.eup %3345 }
 0x86b   : > { %v1808_v28 = vmul.f32 %v3346_v27, %v3344_v13  ;;  %v2563_v13 = vld [vmem:[%s4278_s10 + $0x18] sm:$0xff] }
 0x86d   : > { %3087 = vmatmul.mubr.msk.f32.vlgmr.msra.gmra.mrb[8].mxu0 %vm871_vm4, %v1808_v28 }
 0x86e   : > { %3096 = vmatprep.mubr.msk.f32.mxu0 %vm3619_vm1, %v3620_v34  ;;  %3095 = vmatpush3.msra.mxu0 %v2022_v63 }
 0x86f   : > { %3099 = vmatprep.subr.mxu0 %v2097_v31 }
 0x8c1   : > { %v3093_v29 = vpop.f32.mrb[16].mxu1 }
 0x8c2   : > { %v2013_v30 = vpop.f32.mrb[17].mxu1 }
 0x8c9   : > { %v2259_v32 = vpop.f32.mrb[18].mxu1 }
 0x8ca   : > { %v2263_v33 = vmul.f32 0.35355338, %v2259_v32  ;;  %v3110_v35 = vpop.f32.mrb[19].mxu1 }
 0x8cc   : > { %v2264_v36 = vsel %vm871_vm4, %v2263_v33, -inf }
 0x8cd   : > { %2265 = vmax.xlane.f32.xlu0 %v2264_v36  ;;  %v2275_v37 = vrot.slane %v2264_v36, 4 }
 0x8cf   : > { %v2276_v38 = vmax.f32 %v2264_v36, %v2275_v37 }
 0x8d1   : > { %v2277_v39 = vrot.slane %v2276_v38, 2 }
 0x8d3   : > { %v2278_v40 = vmax.f32 %v2276_v38, %v2277_v39 }
 0x8d5   : > { %v2279_v41 = vrot.slane %v2278_v40, 1 }
 0x8d7   : > { %v2280_v42 = vmax.f32 %v2278_v40, %v2279_v41 }
 0x8d9   : > { %v2281_v43 = vsub.f32 %v2263_v33, %v2280_v42 }
 0x8db   : > { %v2282_v44 = vmul.f32 1.442695, %v2281_v43 }
 0x8dd   : > { %3347 = vpow2.f32 %v2282_v44 }
 0x8e3   : > { %3313 = vrot.lane.b32.xlu0 %v4012_v1, %s3627_s6 }
 0x8e7   : > { %v3348_v45 = vpop.eup %3347 }
 0x8e8   : > { %v2284_v47 = vsel %vm871_vm4, %v3348_v45, 0.0 }
 0x8e9   : > { %v2285_v48 = vrot.slane %v2284_v47, 4 }
 0x8eb   : > { %v2286_v49 = vadd.f32 %v2285_v48, %v2284_v47 }
 0x8ed   : > { %v2287_v50 = vrot.slane %v2286_v49, 2 }
 0x8ef   : > { %v2288_v51 = vadd.f32 %v2287_v50, %v2286_v49 }
 0x8f1   : > { %v2289_v52 = vrot.slane %v2288_v51, 1 }
 0x8f3   : > { %v2290_v53 = vadd.f32 %v2289_v52, %v2288_v51 }
 0x8f5   : > { %3349 = vrcp.f32 %v2290_v53 }
 0x8ff   : > { %v3350_v54 = vpop.eup %3349 }
 0x900   : > { %v2292_v55 = vmul.f32 %v3350_v54, %v3348_v45 }
 0x902   : > { %2372 = vxpose.xlu1.b32.start.end [1/1] (short) (narrow) %v2292_v55, 16 }
 0x940   : > { %v1902_v56 = vpop.f32.mrb[8].mxu0 }
 0x941   : > { %v3088_v57 = vpop.f32.mrb[9].mxu0  ;;  %3097 = vmatmul.mubr.msk.f32.vlgmr.msra.gmra.mrb[10].mxu0 %vm790_vm2, %v1902_v56 }
 0x942   : > { %3101 = vmatprep.mubr.msk.f32.mxu0 %vm790_vm2, %v2013_v30  ;;  %3100 = vmatpush3.msra.mxu0 %v2097_v31 }
 0x943   : > { %3172 = vmatprep.subr.bf16.mxu0 %v3618_v24 }
 0x945   : > { %3102 = vmatmul.mubr.msk.f32.vlgmr.msra.gmra.mrb[6].mxu0 %vm790_vm2, %v3093_v29 }
 0x946   : > { %3115 = vmatprep.mubr.msk.f32.mxu0 %vm3619_vm1, %v3620_v34 }
 0x95a   : > { %v2266_v1 = vpop.xlane.xlu0 %2265 }
 0x95b   : > { %v2267_v58 = vsub.f32 %v2263_v33, %v2266_v1 }
 0x95d   : > { %v2268_v59 = vmul.f32 1.442695, %v2267_v58 }
 0x95e   : > { %v3314_v60 = vpop.permute.xlu0 %3313 }
 0x95f   : > { %3351 = vpow2.f32 %v2268_v59  ;;  %v3316_v62 = vunpack.i.h.bf16 %v3314_v60  ;;  %v3315_v0 = vunpack.i.l.bf16 %v3314_v60 }
 0x961   : > { %v3173_v2 = vpack.c.bf16 %v3316_v62, %v3315_v0 }
 0x963   : > { %3174 = vmatpush3.bf16.msra.mxu0 %v3173_v2 }
 0x964   : > { %3123 = vmatprep.subr.mxu0 %v3620_v34 }
 0x969   : > { %v3352_v3 = vpop.eup %3351 }
 0x96a   : > { %v2270_v4 = vsel %vm871_vm4, %v3352_v3, 0.0 }
 0x96b   : > { %2271 = vadd.xlane.f32.xlu0 %v2270_v4 }
 0x981   : > { %2404 = vrot.lane.b32.xlu0 %v4003_v61, %s3627_s6  ;;  %s2927_s6 = sshll.u32 %s3723_s29, 8 }
 0x982   : > { %v2388_v24 = vpop.trf.xlu1  ;;  %s4155_s29 = scalar_lea.hbm %s4282_s23, %s2927_s6 }
 0x983   : > { %3120 = vmatprep.mubr.msk.f32.mxu1 %vm790_vm2, %v2388_v24 }
 0x986   : > { %v2389_v7 = vpop.trf.xlu1 }
 0x9f8   : > { %v2272_v5 = vpop.xlane.xlu0 %2271 }
 0x9f9   : > { %3353 = vrcp.f32 %v2272_v5 }
 0x9fc   : > { %v2405_v6 = vpop.permute.xlu0 %2404 }
 0x9fd   : > { %3118 = vmatprep.subr.mxu1 %v2405_v6 }
 0x9fe   : > { %3119 = vmatpush3.msra.mxu1 %v2405_v6 }
 0x9ff   : > { %3121 = vmatmul.mubr.msk.f32.vlgmr.msra.gmra.mrb[20].mxu1 %vm790_vm2, %v2389_v7 }
 0xa03   : > { %v3354_v8 = vpop.eup %3353 }
 0xa04   : > { %v2274_v9 = vmul.f32 %v3354_v8, %v3352_v3 }
 0xa06   : > { %3116 = vmatmul.mubr.msk.f32.vlgmr.msra.gmra.mrb[12].mxu0 %vm871_vm4, %v2274_v9 }
 0xa07   : > { %3124 = vmatpush3.msra.mxu0 %v2488_v10  ;;  %3125 = vmatprep.mubr.msk.f32.mxu0 %vm3619_vm1, %v3620_v34 }
 0xa08   : > { %3128 = vmatprep.subr.mxu0 %v2563_v13 }
 0xa14   : > { %v2092_v61 = vpop.f32.mrb[10].mxu0 }
 0xa15   : > { %v2096_v11 = vadd.f32 %v2092_v61, %v4080_v46  ;;  %v3098_v12 = vpop.f32.mrb[11].mxu0  ;;  %v2917_v46 = vld [vmem:[%s4279_s14] ss:$0 sm:$0xff] }
 0xad2   : > { %v3122_v14 = vpop.f32.mrb[20].mxu1 }
 0xad3   : > { %v2479_v15 = vpop.f32.mrb[21].mxu1 }
 0xad9   : > { %v2368_v16 = vpop.f32.mrb[12].mxu0 }
 0xada   : > { %v3117_v17 = vpop.f32.mrb[13].mxu0  ;;  %3126 = vmatmul.mubr.msk.f32.vlgmr.msra.gmra.mrb[14].mxu0 %vm790_vm2, %v2368_v16 }
 0xadb   : > { %3129 = vmatpush3.msra.mxu0 %v2563_v13  ;;  %3130 = vmatprep.mubr.msk.f32.mxu0 %vm790_vm2, %v2479_v15 }
 0xade   : > { %3131 = vmatmul.mubr.msk.f32.vlgmr.msra.gmra.mrb[6].mxu0 %vm790_vm2, %v3122_v14 }
 0xbad   : > { %v2558_v34 = vpop.f32.mrb[14].mxu0 }
 0xbae   : > { %v2562_v18 = vadd.f32 %v2558_v34, %v2096_v11  ;;  %v3127_v19 = vpop.f32.mrb[15].mxu0 }
 0xbb0   : > { %v2654_v21 = vadd.f32 %v2917_v46, %v2562_v18 }
 0xbb1   : > { %v3132_v22 = vpop.f32.mrb[6].mxu0 }
 0xbb2   : > { %v2664_v23 = vadd.f32 %v3132_v22, %v2918_v20  ;;  %v2636_v25 = vpop.f32.mrb[7].mxu0  ;;  %2655 = vst.msk [vmem:[%s542_s15] sm:$0xff] %vm553_vm0, %v2654_v21 }
 0xbb3   : > { %v2663_v26 = vadd.f32 %v2918_v20, %v2636_v25 }
 0xbb4   : > { %3512 = shalt.err (!%p3509_p3)
}
 0xbb5   : > { %s3513_s15 = scalar_lea.hbm %s4147_s22, 128  ;;  %s3517_s14 = scalar_lea.hbm %s4281_s20, 256 }
 0xbb6   : > { %p3514_p9 = scmp.ne.s32.totalorder %s4147_s22, %s3513_s15  ;;  %p3518_p7 = scmp.lt.u32.totalorder %s4147_s22, %s4281_s20 }
 0xbb7   : > { %p3519_p12 = scmp.lt.u32.totalorder %s3517_s14, %s3513_s15  ;;  %p3521_p2 = scmp.lt.u32.totalorder %s3513_s15, %s4147_s22 }
 0xbb8   : > { %p3515_p13 = pnand %p3514_p9, %p3856_p5 }
 0xbb9   : > { %p3520_p1 = por %p3519_p12, %p3518_p7 }
 0xbba   : > { %p3516_p11 = pneg %p3515_p13 }
 0xbbb   : > { %p3522_p4 = por %p3521_p2, %p3520_p1 }
 0xbbd   : > { %p3523_p0 = pnand %p3522_p4, %p3516_p11 }
 0xbbf   : > { %3526 = shalt.err (!%p3523_p0)
}
 0xbc0   : > { %3197 = dma.vmem_to_hbm [thread:$0]  (%p3856_p5), %s4149_s18, 128, %s4147_s22, %s2668_s16   ;;  %2666 = vst.msk [vmem:[%s4129_s9 + $0x8] sm:$0xff] %vm553_vm0, %v2664_v23  ;;  %2665 = vst.msk [vmem:[%s4129_s9] sm:$0xff] %vm553_vm0, %v2663_v26 }
 0xbc1   : > { %s2673_s24 = scalar_lea.sflag [#allocation13], %s3946_s30  ;;  %s3527_s21 = scalar_lea.vmem %s4138_s0, 256 }
 0xbc2   : > { %p3528_p8 = scmp.ne.s32.totalorder %s4138_s0, %s3527_s21  ;;  %s3629_s15 = smov [#allocation12]  }
 0xbc3   : > { %s3531_s6 = sshll.u32 %s3629_s15, 4  ;;  %s3532_s6 = int_to_ptr.vmem [resolvable:$false] %s3531_s6 }
 0xbc4   : > { %p3529_p6 = pnand %p3528_p8, %p3856_p5  ;;  %s3533_s25 = scalar_lea.vmem %s3532_s6, 512 }
 0xbc5   : > { %p3534_p3 = scmp.lt.s32.totalorder %s4138_s0, %s3532_s6  ;;  %p3535_p9 = scmp.lt.s32.totalorder %s3533_s25, %s3527_s21 }
 0xbc6   : > { %p3530_p10 = pneg %p3529_p6 }
 0xbc7   : > { %p3536_p13 = por %p3535_p9, %p3534_p3 }
 0xbc9   : > { %p3537_p11 = pnand %p3536_p13, %p3530_p10 }
 0xbcb   : > { %3540 = shalt.err (!%p3537_p11)
}
 0xbcc   : > { %s3541_s9 = scalar_lea.hbm %s4155_s29, 256  ;;  %s3545_s16 = scalar_lea.hbm %s4282_s23, 512 }
 0xbcd   : > { %p3542_p7 = scmp.ne.s32.totalorder %s4155_s29, %s3541_s9  ;;  %p3546_p2 = scmp.lt.u32.totalorder %s4155_s29, %s4282_s23 }
 0xbce   : > { %p3547_p4 = scmp.lt.u32.totalorder %s3545_s16, %s3541_s9  ;;  %p3549_p8 = scmp.lt.u32.totalorder %s3541_s9, %s4155_s29 }
 0xbcf   : > { %p3543_p12 = pnand %p3542_p7, %p3856_p5 }
 0xbd0   : > { %p3548_p0 = por %p3547_p4, %p3546_p2 }
 0xbd1   : > { %p3544_p1 = pneg %p3543_p12 }
 0xbd2   : > { %p3550_p6 = por %p3549_p8, %p3548_p0 }
 0xbd4   : > { %p3551_p10 = pnand %p3550_p6, %p3544_p1 }
 0xbd6   : > { %3554 = shalt.err (!%p3551_p10)
}
 0xbd7   : > { %s3630_s17 = smov 128   ;;  %s3631_s21 = smov 8  }
 0xbd8   : > { %3198 = dma.vmem_to_hbm [thread:$0]  (%p3856_p5), %s4138_s0, 256, %s4155_s29, %s2673_s24, %s3630_s17, %s3630_s17, %s3631_s21  }
 0xbd9 PF: > { %s4283_s15 = sld [smem:[#allocation20_spill]]  ;;  %s4284_s6 = sld [smem:[#allocation21_spill]] }
 0xbda   : > { %p4286_p9 = scmp.ge.s32.totalorder %s3609_s28, 2 }
 0xbdf   : > { %s2714_s25 = sand.u32 1, %s4283_s15   ;;  %p4285_p3 = scmp.ne.s32.totalorder %s4284_s6, 0 }
 0xbe0   : > { %s2715_s9 = scalar_lea.sflag [#allocation4], %s2714_s25 }
 0xbe1   : > { %p3219_p13 = pnand %p4286_p9, %p4285_p3 }
 0xbe3   : > { %3588 = dma.done.wait (!%p3219_p13), %s2715_s9, 128  }
 0xbe4   : > { %3590 = vsyncadd (!%p3219_p13), %s2715_s9, 4294967168  ;;  %s2724_s18 = scalar_lea.sflag [#allocation13], %s2714_s25 }
 0xbe5   : > { %3592 = dma.done.wait (!%p3219_p13), %s2724_s18, 256  }
 0xbe6   : > { %3594 = vsyncadd (!%p3219_p13), %s2724_s18, 4294967040  ;;  %p34_p5 = scmp.ge.s32.totalorder %s3842_s13, 4   ;;  %s4287_s25 = smov %s3601_s26 }
 0xbe7   : > { %s4288_s26 = smov %s3605_s27  ;;  %s4289_s27 = smov %s3852_s11 }
 0xbe8   : > { %s4290_s28 = smov %s3842_s13  ;;  %36 = sbr.rel (!%p34_p5) target bundleno = 18 (0x12), region = 155 }
 0xbef   :  { %2729 = vsyncpa [#allocation3], 1 }
 0xbf0   :  { %2731 = vsyncpa [#allocation3 + $0x1], 1 }
 0xbf1   :  { %2732 = vsyncpa [#allocation6], 1 }
 0xbf2   :  { %2734 = vsyncpa [#allocation6 + $0x1], 1 }
 0xbf3   :  { %2735 = vsyncpa [#allocation9], 1 }
 0xbf4   :  { %2736 = vsyncpa [#allocation4], 1 }
 0xbf5   :  { %2738 = vsyncpa [#allocation4 + $0x1], 1 }
 0xbf6   :  { %2739 = vsyncpa [#allocation13], 1 }
 0xbf7   :  { %2741 = vsyncpa [#allocation13 + $0x1], 1 }

</bundles_post_ra>
